<compile_context>
chip_gen: v6e
topology: v6e:2x2x1
jax: 0.10.0
libtpu: 0.0.40
codegen_flags: <defaults>
</compile_context>

<pallas_src>
import functools

import jax
import jax.numpy as jnp
from jax.experimental import pallas as pl
from jax.experimental.pallas import tpu as pltpu

LN_EPS = 1e-12


def _layernorm(x, w, b):
    # TF-style layernorm: epsilon inside the square root, biased variance.
    w = w.astype(jnp.float32)
    b = b.astype(jnp.float32)
    mean = jnp.mean(x, axis=-1, keepdims=True)
    var = jnp.mean((x - mean) ** 2, axis=-1, keepdims=True)
    x = (x - mean) / jnp.sqrt(var + LN_EPS)
    return w * x + b


def encoder_layer_kernel(xq_ref, xkv_ref,
                         wq_ref, bq_ref, wk_ref, bk_ref, wv_ref, bv_ref,
                         wo_ref, bo_ref,
                         w1_ref, b1_ref, w2_ref, b2_ref,
                         ln_in_w_ref, ln_in_b_ref, ln_out_w_ref, ln_out_b_ref,
                         o_ref,
                         k_sc, v_sc, *, num_heads):
    # One grid step handles one (batch, query-row-block) pair.
    q_blk = pl.program_id(1)

    # ---- K/V projections: compute once per batch row, cache in VMEM scratch.
    # The key/value rows depend only on the full sequence (same for every
    # query block), so only the first query block of each batch computes them;
    # the q-axis is marked "arbitrary" so the scratch legitimately carries
    # state across it.
    @pl.when(q_blk == 0)
    def _():
        xkv = xkv_ref[0]                                              # (S, D)
        for h in range(num_heads):
            k_sc[h] = jnp.dot(xkv, wk_ref[h],
                              preferred_element_type=jnp.float32) + bk_ref[h]
            v_sc[h] = jnp.dot(xkv, wv_ref[h],
                              preferred_element_type=jnp.float32) + bv_ref[h]

    xq = xq_ref[0]                                  # (TQ, D), stored dtype
    TQ, D = xq.shape
    dh = wq_ref.shape[2]
    scale = jnp.float32(1.0 / (dh ** 0.5))

    xq_f32 = xq.astype(jnp.float32)                 # f32 residual stream

    # ---- multi-head self attention (Q = K = V = x, mask=None) ----
    # Accumulate the output projection per head: sum_h ctx_h @ Wo_h + bo.
    attn = jnp.broadcast_to(bo_ref[...].astype(jnp.float32), (TQ, D))
    # Static unroll over heads (small num_heads). For num_heads >= 8 switch to
    # lax.fori_loop(unroll=True) to bound live vreg ranges.
    for h in range(num_heads):
        qh = jnp.dot(xq, wq_ref[h],
                     preferred_element_type=jnp.float32) + bq_ref[h]  # (TQ, dh)
        kh = k_sc[h]                                                  # (S, dh)
        vh = v_sc[h]                                                  # (S, dh)

        # Scores: contract the last dims directly (no kh.T materialization).
        s = jax.lax.dot_general(
            qh, kh, dimension_numbers=(((1,), (1,)), ((), ())),
            preferred_element_type=jnp.float32) * scale               # (TQ, S)
        s = s - jnp.max(s, axis=-1, keepdims=True)                    # stable softmax
        p = jnp.exp(s)
        # Exact reciprocal keeps f32 parity with the reference; approx=True
        # would move the divide to the EUP at slightly reduced precision.
        p = p * pl.reciprocal(jnp.sum(p, axis=-1, keepdims=True), approx=False)

        ctx = jnp.dot(p, vh, preferred_element_type=jnp.float32)      # (TQ, dh)
        attn = attn + jnp.dot(ctx, wo_ref[h],
                              preferred_element_type=jnp.float32)     # (TQ, D)

    # dropout == identity in eval mode
    x1 = xq_f32 + attn

    # ---- norm_in ----
    normed = _layernorm(x1, ln_in_w_ref[...], ln_in_b_ref[...])

    # ---- position-wise feed forward: Linear -> ReLU -> Linear ----
    hdn = jnp.dot(normed.astype(w1_ref.dtype), w1_ref[...],
                  preferred_element_type=jnp.float32) + b1_ref[...]
    hdn = jnp.maximum(hdn, 0.0)
    ff = jnp.dot(hdn.astype(w2_ref.dtype), w2_ref[...],
                 preferred_element_type=jnp.float32) + b2_ref[...]

    # dropout == identity in eval mode
    x2 = x1 + ff

    # ---- norm_out ----
    out = _layernorm(x2, ln_out_w_ref[...], ln_out_b_ref[...])
    o_ref[0] = out.astype(o_ref.dtype)


def encoder_layer(x, params, num_heads, q_block=None):
    B, S, D = x.shape
    assert D % num_heads == 0
    dh = D // num_heads
    d_ff = params["w1"].shape[1]

    # Tile the sequence into query-row blocks (second grid axis).
    if q_block is None:
        q_block = 128 if S % 128 == 0 else S
    assert S % q_block == 0
    n_q = S // q_block

    # Host-side layout plumbing: head-major weight/bias slabs so the kernel
    # never slices or concatenates activations along the lane (feature) dim.
    wq_h = params["wq"].reshape(D, num_heads, dh).transpose(1, 0, 2)   # (H, D, dh)
    wk_h = params["wk"].reshape(D, num_heads, dh).transpose(1, 0, 2)
    wv_h = params["wv"].reshape(D, num_heads, dh).transpose(1, 0, 2)
    bq_h = params["bq"].reshape(1, num_heads, dh).transpose(1, 0, 2)   # (H, 1, dh)
    bk_h = params["bk"].reshape(1, num_heads, dh).transpose(1, 0, 2)
    bv_h = params["bv"].reshape(1, num_heads, dh).transpose(1, 0, 2)
    wo_h = params["wo"].reshape(num_heads, dh, D)                      # (H, dh, D)

    ordered = [
        wq_h, bq_h, wk_h, bk_h, wv_h, bv_h, wo_h, params["bo"],
        params["w1"], params["b1"], params["w2"], params["b2"],
        params["ln_in_w"], params["ln_in_b"],
        params["ln_out_w"], params["ln_out_b"],
    ]

    def const_spec(a):
        # Constant index_map: the block never changes across the grid, so
        # Pallas keeps it resident instead of re-DMAing it per step.
        # (For very large models: mark these pipeline_mode=pl.Buffered(1)
        #  and/or store in bf16 to halve resident weight VMEM on v7x.)
        zeros = (0,) * a.ndim
        return pl.BlockSpec(a.shape, lambda b, q, _z=zeros: _z)

    in_specs = [
        pl.BlockSpec((1, q_block, D), lambda b, q: (b, q, 0)),   # query-row block
        pl.BlockSpec((1, S, D), lambda b, q: (b, 0, 0)),         # full rows for K/V
    ] + [const_spec(a) for a in ordered]
    out_specs = pl.BlockSpec((1, q_block, D), lambda b, q: (b, q, 0))

    # Head-major K/V cache in VMEM scratch, persistent across the q axis.
    scratch_shapes = [
        pltpu.VMEM((num_heads, S, dh), jnp.float32),   # K per head
        pltpu.VMEM((num_heads, S, dh), jnp.float32),   # V per head
    ]

    # Advisory cost estimate for XLA scheduling around the custom call.
    flops = int(2 * B * S * (4 * D * D + 2 * S * D + 2 * D * d_ff))
    transcendentals = int(B * num_heads * S * S)
    param_bytes = sum(int(a.size) * a.dtype.itemsize for a in ordered)
    bytes_accessed = int(3 * x.size * x.dtype.itemsize) + param_bytes

    # Explicit scoped-VMEM budget (defaults: 16 MiB v5e / 32 MiB v6e, v7x).
    head_lane = max(dh, 128)   # per-head scratch slab is lane-padded to 128
    kv_scratch_bytes = 2 * num_heads * S * head_lane * 4
    act_bytes = 4 * (q_block * (S + d_ff + 8 * D) + S * D)
    resident_bytes = 2 * (param_bytes
                          + x.dtype.itemsize * (2 * q_block * D + S * D))
    vmem_limit = min(max(32 * 1024 * 1024,
                         int(2 * (resident_bytes + act_bytes
                                  + kv_scratch_bytes))),
                     64 * 1024 * 1024)

    kernel = functools.partial(encoder_layer_kernel, num_heads=num_heads)

    return pl.pallas_call(
        kernel,
        out_shape=jax.ShapeDtypeStruct((B, S, D), x.dtype),
        grid_spec=pltpu.PrefetchScalarGridSpec(
            num_scalar_prefetch=0,
            grid=(B, n_q),
            in_specs=in_specs,
            out_specs=out_specs,
            scratch_shapes=scratch_shapes,
        ),
        compiler_params=pltpu.CompilerParams(
            # q axis carries the K/V scratch cache -> "arbitrary"; batch axis
            # is independent -> "parallel" (megacore shards it).
            dimension_semantics=("parallel", "arbitrary"),
            vmem_limit_bytes=vmem_limit),
        cost_estimate=pl.CostEstimate(
            flops=flops,
            transcendentals=transcendentals,
            bytes_accessed=bytes_accessed),
    )(x, x, *ordered)


def ref_encoder_layer(x, p, num_heads):
    """Pure-JAX reference with identical math (for a correctness check)."""
    B, S, D = x.shape
    dh = D // num_heads
    scale = 1.0 / jnp.sqrt(jnp.float32(dh))

    q = x @ p["wq"] + p["bq"]
    k = x @ p["wk"] + p["bk"]
    v = x @ p["wv"] + p["bv"]
    qh = q.reshape(B, S, num_heads, dh).transpose(0, 2, 1, 3)
    kh = k.reshape(B, S, num_heads, dh).transpose(0, 2, 1, 3)
    vh = v.reshape(B, S, num_heads, dh).transpose(0, 2, 1, 3)
    s = jnp.einsum("bhqd,bhkd->bhqk", qh, kh) * scale
    pattn = jax.nn.softmax(s, axis=-1)
    ctx = jnp.einsum("bhqk,bhkd->bhqd", pattn, vh)
    ctx = ctx.transpose(0, 2, 1, 3).reshape(B, S, D)
    attn_out = ctx @ p["wo"] + p["bo"]

    x1 = x + attn_out
    normed = _layernorm(x1, p["ln_in_w"], p["ln_in_b"])
    ff = jnp.maximum(normed @ p["w1"] + p["b1"], 0.0) @ p["w2"] + p["b2"]
    x2 = x1 + ff
    return _layernorm(x2, p["ln_out_w"], p["ln_out_b"])


def make_params(key, d_model, d_ff):
    ks = jax.random.split(key, 12)
    sc = 1.0 / jnp.sqrt(jnp.float32(d_model))
    p = {
        "wq": jax.random.normal(ks[0], (d_model, d_model), jnp.float32) * sc,
        "bq": jax.random.normal(ks[1], (1, d_model), jnp.float32) * 0.02,
        "wk": jax.random.normal(ks[2], (d_model, d_model), jnp.float32) * sc,
        "bk": jax.random.normal(ks[3], (1, d_model), jnp.float32) * 0.02,
        "wv": jax.random.normal(ks[4], (d_model, d_model), jnp.float32) * sc,
        "bv": jax.random.normal(ks[5], (1, d_model), jnp.float32) * 0.02,
        "wo": jax.random.normal(ks[6], (d_model, d_model), jnp.float32) * sc,
        "bo": jax.random.normal(ks[7], (1, d_model), jnp.float32) * 0.02,
        "w1": jax.random.normal(ks[8], (d_model, d_ff), jnp.float32) * sc,
        "b1": jax.random.normal(ks[9], (1, d_ff), jnp.float32) * 0.02,
        "w2": jax.random.normal(ks[10], (d_ff, d_model), jnp.float32)
              * (1.0 / jnp.sqrt(jnp.float32(d_ff))),
        "b2": jax.random.normal(ks[11], (1, d_model), jnp.float32) * 0.02,
        # LayerNorm params: module inits to ones/zeros; perturb slightly so the
        # affine part is actually exercised (still deterministic).
        "ln_in_w": jnp.ones((1, d_model), jnp.float32) * 1.1,
        "ln_in_b": jnp.full((1, d_model), 0.05, jnp.float32),
        "ln_out_w": jnp.ones((1, d_model), jnp.float32) * 0.9,
        "ln_out_b": jnp.full((1, d_model), -0.03, jnp.float32),
    }
    return p


if __name__ == "__main__":
    # Small-shape correctness check (single query block per batch row).
    B, S, D = 2, 8, 32
    num_heads = 4
    d_ff = 64

    key = jax.random.PRNGKey(0)
    kx, kp = jax.random.split(key)
    x = jax.random.normal(kx, (B, S, D), jnp.float32)
    params = make_params(kp, D, d_ff)

    out = encoder_layer(x, params, num_heads)
    out = jax.block_until_ready(out)

    ref = ref_encoder_layer(x, params, num_heads)
    assert out.shape == (B, S, D)
    assert jnp.allclose(out, ref, rtol=1e-4, atol=1e-4), (
        float(jnp.max(jnp.abs(out - ref))))

    # Second check exercising the multi-query-block path (the cached K/V
    # scratch is reused across q blocks within a batch row).
    B2, S2, D2, H2, F2 = 2, 256, 128, 4, 256
    kx2, kp2 = jax.random.split(jax.random.PRNGKey(1))
    x2 = jax.random.normal(kx2, (B2, S2, D2), jnp.float32)
    params2 = make_params(kp2, D2, F2)
    out2 = jax.block_until_ready(
        encoder_layer(x2, params2, H2, q_block=128))
    ref2 = ref_encoder_layer(x2, params2, H2)
    assert jnp.allclose(out2, ref2, rtol=1e-4, atol=1e-4), (
        float(jnp.max(jnp.abs(out2 - ref2))))

    print("KERNEL_OK")
</pallas_src>

<mosaic_0001>
module attributes {stable_mosaic.version = 11 : i64} {
  func.func @encoder_layer_kernel(%arg0: i32, %arg1: i32, %arg2: memref<1x8x32xf32, #tpu.memory_space<vmem>>, %arg3: memref<1x8x32xf32, #tpu.memory_space<vmem>>, %arg4: memref<4x32x8xf32, #tpu.memory_space<vmem>>, %arg5: memref<4x1x8xf32, #tpu.memory_space<vmem>>, %arg6: memref<4x32x8xf32, #tpu.memory_space<vmem>>, %arg7: memref<4x1x8xf32, #tpu.memory_space<vmem>>, %arg8: memref<4x32x8xf32, #tpu.memory_space<vmem>>, %arg9: memref<4x1x8xf32, #tpu.memory_space<vmem>>, %arg10: memref<4x8x32xf32, #tpu.memory_space<vmem>>, %arg11: memref<1x32xf32, #tpu.memory_space<vmem>>, %arg12: memref<32x64xf32, #tpu.memory_space<vmem>>, %arg13: memref<1x64xf32, #tpu.memory_space<vmem>>, %arg14: memref<64x32xf32, #tpu.memory_space<vmem>>, %arg15: memref<1x32xf32, #tpu.memory_space<vmem>>, %arg16: memref<1x32xf32, #tpu.memory_space<vmem>>, %arg17: memref<1x32xf32, #tpu.memory_space<vmem>>, %arg18: memref<1x32xf32, #tpu.memory_space<vmem>>, %arg19: memref<1x32xf32, #tpu.memory_space<vmem>>, %arg20: memref<1x8x32xf32, #tpu.memory_space<vmem>>, %arg21: memref<4x8x8xf32, #tpu.memory_space<vmem>>, %arg22: memref<4x8x8xf32, #tpu.memory_space<vmem>>) attributes {dimension_semantics = [#tpu.dimension_semantics<parallel>, #tpu.dimension_semantics<arbitrary>], iteration_bounds = array<i64: 2, 1>, scalar_prefetch = 0 : i64, scratch_operands = 2 : i64, tpu.core_type = #tpu.core_type<tc>, window_params = [{transform_indices = @transform_0, window_bounds = array<i64: 1, 8, 32>}, {transform_indices = @transform_1, window_bounds = array<i64: 1, 8, 32>}, {pipeline_mode = #tpu.pipeline_mode<synchronous>, transform_indices = @transform_2, window_bounds = array<i64: 4, 32, 8>}, {pipeline_mode = #tpu.pipeline_mode<synchronous>, transform_indices = @transform_3, window_bounds = array<i64: 4, 1, 8>}, {pipeline_mode = #tpu.pipeline_mode<synchronous>, transform_indices = @transform_4, window_bounds = array<i64: 4, 32, 8>}, {pipeline_mode = #tpu.pipeline_mode<synchronous>, transform_indices = @transform_5, window_bounds = array<i64: 4, 1, 8>}, {pipeline_mode = #tpu.pipeline_mode<synchronous>, transform_indices = @transform_6, window_bounds = array<i64: 4, 32, 8>}, {pipeline_mode = #tpu.pipeline_mode<synchronous>, transform_indices = @transform_7, window_bounds = array<i64: 4, 1, 8>}, {pipeline_mode = #tpu.pipeline_mode<synchronous>, transform_indices = @transform_8, window_bounds = array<i64: 4, 8, 32>}, {pipeline_mode = #tpu.pipeline_mode<synchronous>, transform_indices = @transform_9, window_bounds = array<i64: 1, 32>}, {pipeline_mode = #tpu.pipeline_mode<synchronous>, transform_indices = @transform_10, window_bounds = array<i64: 32, 64>}, {pipeline_mode = #tpu.pipeline_mode<synchronous>, transform_indices = @transform_11, window_bounds = array<i64: 1, 64>}, {pipeline_mode = #tpu.pipeline_mode<synchronous>, transform_indices = @transform_12, window_bounds = array<i64: 64, 32>}, {pipeline_mode = #tpu.pipeline_mode<synchronous>, transform_indices = @transform_13, window_bounds = array<i64: 1, 32>}, {pipeline_mode = #tpu.pipeline_mode<synchronous>, transform_indices = @transform_14, window_bounds = array<i64: 1, 32>}, {pipeline_mode = #tpu.pipeline_mode<synchronous>, transform_indices = @transform_15, window_bounds = array<i64: 1, 32>}, {pipeline_mode = #tpu.pipeline_mode<synchronous>, transform_indices = @transform_16, window_bounds = array<i64: 1, 32>}, {pipeline_mode = #tpu.pipeline_mode<synchronous>, transform_indices = @transform_17, window_bounds = array<i64: 1, 32>}, {transform_indices = @transform_18, window_bounds = array<i64: 1, 8, 32>}]} {
    %c0_i32 = arith.constant 0 : i32
    %0 = arith.cmpi eq, %arg1, %c0_i32 : i32
    %1 = arith.extui %0 : i1 to i32
    %c0_i32_0 = arith.constant 0 : i32
    %2 = arith.cmpi ne, %1, %c0_i32_0 : i32
    scf.if %2 {
      %c0_121 = arith.constant 0 : index
      %c0_122 = arith.constant 0 : index
      %c0_123 = arith.constant 0 : index
      %189 = vector.load %arg3[%c0_121, %c0_122, %c0_123] : memref<1x8x32xf32, #tpu.memory_space<vmem>>, vector<1x8x32xf32>
      %190 = vector.shape_cast %189 : vector<1x8x32xf32> to vector<8x32xf32>
      %c0_124 = arith.constant 0 : index
      %c0_125 = arith.constant 0 : index
      %c0_126 = arith.constant 0 : index
      %191 = vector.load %arg6[%c0_124, %c0_125, %c0_126] : memref<4x32x8xf32, #tpu.memory_space<vmem>>, vector<1x32x8xf32>
      %192 = vector.shape_cast %191 : vector<1x32x8xf32> to vector<32x8xf32>
      %cst_127 = arith.constant dense<0.000000e+00> : vector<8x8xf32>
      %193 = tpu.matmul %190, %192, %cst_127 {dimension_numbers = #tpu.dot_dimension_numbers<[1], [0], [0], [1], [0, 0, 1, 1], [], []>} : vector<8x32xf32>, vector<32x8xf32>, vector<8x8xf32> -> vector<8x8xf32>
      %c0_128 = arith.constant 0 : index
      %c0_129 = arith.constant 0 : index
      %c0_130 = arith.constant 0 : index
      %194 = vector.load %arg7[%c0_128, %c0_129, %c0_130] : memref<4x1x8xf32, #tpu.memory_space<vmem>>, vector<1x1x8xf32>
      %195 = vector.shape_cast %194 : vector<1x1x8xf32> to vector<1x8xf32>
      %196 = vector.broadcast %195 : vector<1x8xf32> to vector<8x8xf32>
      %197 = arith.addf %193, %196 : vector<8x8xf32>
      %c0_131 = arith.constant 0 : index
      %c0_132 = arith.constant 0 : index
      %c0_133 = arith.constant 0 : index
      %198 = vector.load %arg21[%c0_131, %c0_132, %c0_133] : memref<4x8x8xf32, #tpu.memory_space<vmem>>, vector<1x8x8xf32>
      %199 = vector.shape_cast %198 : vector<1x8x8xf32> to vector<8x8xf32>
      %200 = vector.shape_cast %197 : vector<8x8xf32> to vector<1x8x8xf32>
      tpu.vector_store %arg21[%c0_131, %c0_132, %c0_133], %200 {strides = array<i32>} : memref<4x8x8xf32, #tpu.memory_space<vmem>>, vector<1x8x8xf32>,
      %c0_134 = arith.constant 0 : index
      %c0_135 = arith.constant 0 : index
      %c0_136 = arith.constant 0 : index
      %201 = vector.load %arg8[%c0_134, %c0_135, %c0_136] : memref<4x32x8xf32, #tpu.memory_space<vmem>>, vector<1x32x8xf32>
      %202 = vector.shape_cast %201 : vector<1x32x8xf32> to vector<32x8xf32>
      %cst_137 = arith.constant dense<0.000000e+00> : vector<8x8xf32>
      %203 = tpu.matmul %190, %202, %cst_137 {dimension_numbers = #tpu.dot_dimension_numbers<[1], [0], [0], [1], [0, 0, 1, 1], [], []>} : vector<8x32xf32>, vector<32x8xf32>, vector<8x8xf32> -> vector<8x8xf32>
      %c0_138 = arith.constant 0 : index
      %c0_139 = arith.constant 0 : index
      %c0_140 = arith.constant 0 : index
      %204 = vector.load %arg9[%c0_138, %c0_139, %c0_140] : memref<4x1x8xf32, #tpu.memory_space<vmem>>, vector<1x1x8xf32>
      %205 = vector.shape_cast %204 : vector<1x1x8xf32> to vector<1x8xf32>
      %206 = vector.broadcast %205 : vector<1x8xf32> to vector<8x8xf32>
      %207 = arith.addf %203, %206 : vector<8x8xf32>
      %c0_141 = arith.constant 0 : index
      %c0_142 = arith.constant 0 : index
      %c0_143 = arith.constant 0 : index
      %208 = vector.load %arg22[%c0_141, %c0_142, %c0_143] : memref<4x8x8xf32, #tpu.memory_space<vmem>>, vector<1x8x8xf32>
      %209 = vector.shape_cast %208 : vector<1x8x8xf32> to vector<8x8xf32>
      %210 = vector.shape_cast %207 : vector<8x8xf32> to vector<1x8x8xf32>
      tpu.vector_store %arg22[%c0_141, %c0_142, %c0_143], %210 {strides = array<i32>} : memref<4x8x8xf32, #tpu.memory_space<vmem>>, vector<1x8x8xf32>,
      %c1_144 = arith.constant 1 : index
      %c0_145 = arith.constant 0 : index
      %c0_146 = arith.constant 0 : index
      %211 = vector.load %arg6[%c1_144, %c0_145, %c0_146] : memref<4x32x8xf32, #tpu.memory_space<vmem>>, vector<1x32x8xf32>
      %212 = vector.shape_cast %211 : vector<1x32x8xf32> to vector<32x8xf32>
      %cst_147 = arith.constant dense<0.000000e+00> : vector<8x8xf32>
      %213 = tpu.matmul %190, %212, %cst_147 {dimension_numbers = #tpu.dot_dimension_numbers<[1], [0], [0], [1], [0, 0, 1, 1], [], []>} : vector<8x32xf32>, vector<32x8xf32>, vector<8x8xf32> -> vector<8x8xf32>
      %c1_148 = arith.constant 1 : index
      %c0_149 = arith.constant 0 : index
      %c0_150 = arith.constant 0 : index
      %214 = vector.load %arg7[%c1_148, %c0_149, %c0_150] : memref<4x1x8xf32, #tpu.memory_space<vmem>>, vector<1x1x8xf32>
      %215 = vector.shape_cast %214 : vector<1x1x8xf32> to vector<1x8xf32>
      %216 = vector.broadcast %215 : vector<1x8xf32> to vector<8x8xf32>
      %217 = arith.addf %213, %216 : vector<8x8xf32>
      %c1_151 = arith.constant 1 : index
      %c0_152 = arith.constant 0 : index
      %c0_153 = arith.constant 0 : index
      %218 = vector.load %arg21[%c1_151, %c0_152, %c0_153] : memref<4x8x8xf32, #tpu.memory_space<vmem>>, vector<1x8x8xf32>
      %219 = vector.shape_cast %218 : vector<1x8x8xf32> to vector<8x8xf32>
      %220 = vector.shape_cast %217 : vector<8x8xf32> to vector<1x8x8xf32>
      tpu.vector_store %arg21[%c1_151, %c0_152, %c0_153], %220 {strides = array<i32>} : memref<4x8x8xf32, #tpu.memory_space<vmem>>, vector<1x8x8xf32>,
      %c1_154 = arith.constant 1 : index
      %c0_155 = arith.constant 0 : index
      %c0_156 = arith.constant 0 : index
      %221 = vector.load %arg8[%c1_154, %c0_155, %c0_156] : memref<4x32x8xf32, #tpu.memory_space<vmem>>, vector<1x32x8xf32>
      %222 = vector.shape_cast %221 : vector<1x32x8xf32> to vector<32x8xf32>
      %cst_157 = arith.constant dense<0.000000e+00> : vector<8x8xf32>
      %223 = tpu.matmul %190, %222, %cst_157 {dimension_numbers = #tpu.dot_dimension_numbers<[1], [0], [0], [1], [0, 0, 1, 1], [], []>} : vector<8x32xf32>, vector<32x8xf32>, vector<8x8xf32> -> vector<8x8xf32>
      %c1_158 = arith.constant 1 : index
      %c0_159 = arith.constant 0 : index
      %c0_160 = arith.constant 0 : index
      %224 = vector.load %arg9[%c1_158, %c0_159, %c0_160] : memref<4x1x8xf32, #tpu.memory_space<vmem>>, vector<1x1x8xf32>
      %225 = vector.shape_cast %224 : vector<1x1x8xf32> to vector<1x8xf32>
      %226 = vector.broadcast %225 : vector<1x8xf32> to vector<8x8xf32>
      %227 = arith.addf %223, %226 : vector<8x8xf32>
      %c1_161 = arith.constant 1 : index
      %c0_162 = arith.constant 0 : index
      %c0_163 = arith.constant 0 : index
      %228 = vector.load %arg22[%c1_161, %c0_162, %c0_163] : memref<4x8x8xf32, #tpu.memory_space<vmem>>, vector<1x8x8xf32>
      %229 = vector.shape_cast %228 : vector<1x8x8xf32> to vector<8x8xf32>
      %230 = vector.shape_cast %227 : vector<8x8xf32> to vector<1x8x8xf32>
      tpu.vector_store %arg22[%c1_161, %c0_162, %c0_163], %230 {strides = array<i32>} : memref<4x8x8xf32, #tpu.memory_space<vmem>>, vector<1x8x8xf32>,
      %c2_164 = arith.constant 2 : index
      %c0_165 = arith.constant 0 : index
      %c0_166 = arith.constant 0 : index
      %231 = vector.load %arg6[%c2_164, %c0_165, %c0_166] : memref<4x32x8xf32, #tpu.memory_space<vmem>>, vector<1x32x8xf32>
      %232 = vector.shape_cast %231 : vector<1x32x8xf32> to vector<32x8xf32>
      %cst_167 = arith.constant dense<0.000000e+00> : vector<8x8xf32>
      %233 = tpu.matmul %190, %232, %cst_167 {dimension_numbers = #tpu.dot_dimension_numbers<[1], [0], [0], [1], [0, 0, 1, 1], [], []>} : vector<8x32xf32>, vector<32x8xf32>, vector<8x8xf32> -> vector<8x8xf32>
      %c2_168 = arith.constant 2 : index
      %c0_169 = arith.constant 0 : index
      %c0_170 = arith.constant 0 : index
      %234 = vector.load %arg7[%c2_168, %c0_169, %c0_170] : memref<4x1x8xf32, #tpu.memory_space<vmem>>, vector<1x1x8xf32>
      %235 = vector.shape_cast %234 : vector<1x1x8xf32> to vector<1x8xf32>
      %236 = vector.broadcast %235 : vector<1x8xf32> to vector<8x8xf32>
      %237 = arith.addf %233, %236 : vector<8x8xf32>
      %c2_171 = arith.constant 2 : index
      %c0_172 = arith.constant 0 : index
      %c0_173 = arith.constant 0 : index
      %238 = vector.load %arg21[%c2_171, %c0_172, %c0_173] : memref<4x8x8xf32, #tpu.memory_space<vmem>>, vector<1x8x8xf32>
      %239 = vector.shape_cast %238 : vector<1x8x8xf32> to vector<8x8xf32>
      %240 = vector.shape_cast %237 : vector<8x8xf32> to vector<1x8x8xf32>
      tpu.vector_store %arg21[%c2_171, %c0_172, %c0_173], %240 {strides = array<i32>} : memref<4x8x8xf32, #tpu.memory_space<vmem>>, vector<1x8x8xf32>,
      %c2_174 = arith.constant 2 : index
      %c0_175 = arith.constant 0 : index
      %c0_176 = arith.constant 0 : index
      %241 = vector.load %arg8[%c2_174, %c0_175, %c0_176] : memref<4x32x8xf32, #tpu.memory_space<vmem>>, vector<1x32x8xf32>
      %242 = vector.shape_cast %241 : vector<1x32x8xf32> to vector<32x8xf32>
      %cst_177 = arith.constant dense<0.000000e+00> : vector<8x8xf32>
      %243 = tpu.matmul %190, %242, %cst_177 {dimension_numbers = #tpu.dot_dimension_numbers<[1], [0], [0], [1], [0, 0, 1, 1], [], []>} : vector<8x32xf32>, vector<32x8xf32>, vector<8x8xf32> -> vector<8x8xf32>
      %c2_178 = arith.constant 2 : index
      %c0_179 = arith.constant 0 : index
      %c0_180 = arith.constant 0 : index
      %244 = vector.load %arg9[%c2_178, %c0_179, %c0_180] : memref<4x1x8xf32, #tpu.memory_space<vmem>>, vector<1x1x8xf32>
      %245 = vector.shape_cast %244 : vector<1x1x8xf32> to vector<1x8xf32>
      %246 = vector.broadcast %245 : vector<1x8xf32> to vector<8x8xf32>
      %247 = arith.addf %243, %246 : vector<8x8xf32>
      %c2_181 = arith.constant 2 : index
      %c0_182 = arith.constant 0 : index
      %c0_183 = arith.constant 0 : index
      %248 = vector.load %arg22[%c2_181, %c0_182, %c0_183] : memref<4x8x8xf32, #tpu.memory_space<vmem>>, vector<1x8x8xf32>
      %249 = vector.shape_cast %248 : vector<1x8x8xf32> to vector<8x8xf32>
      %250 = vector.shape_cast %247 : vector<8x8xf32> to vector<1x8x8xf32>
      tpu.vector_store %arg22[%c2_181, %c0_182, %c0_183], %250 {strides = array<i32>} : memref<4x8x8xf32, #tpu.memory_space<vmem>>, vector<1x8x8xf32>,
      %c3_184 = arith.constant 3 : index
      %c0_185 = arith.constant 0 : index
      %c0_186 = arith.constant 0 : index
      %251 = vector.load %arg6[%c3_184, %c0_185, %c0_186] : memref<4x32x8xf32, #tpu.memory_space<vmem>>, vector<1x32x8xf32>
      %252 = vector.shape_cast %251 : vector<1x32x8xf32> to vector<32x8xf32>
      %cst_187 = arith.constant dense<0.000000e+00> : vector<8x8xf32>
      %253 = tpu.matmul %190, %252, %cst_187 {dimension_numbers = #tpu.dot_dimension_numbers<[1], [0], [0], [1], [0, 0, 1, 1], [], []>} : vector<8x32xf32>, vector<32x8xf32>, vector<8x8xf32> -> vector<8x8xf32>
      %c3_188 = arith.constant 3 : index
      %c0_189 = arith.constant 0 : index
      %c0_190 = arith.constant 0 : index
      %254 = vector.load %arg7[%c3_188, %c0_189, %c0_190] : memref<4x1x8xf32, #tpu.memory_space<vmem>>, vector<1x1x8xf32>
      %255 = vector.shape_cast %254 : vector<1x1x8xf32> to vector<1x8xf32>
      %256 = vector.broadcast %255 : vector<1x8xf32> to vector<8x8xf32>
      %257 = arith.addf %253, %256 : vector<8x8xf32>
      %c3_191 = arith.constant 3 : index
      %c0_192 = arith.constant 0 : index
      %c0_193 = arith.constant 0 : index
      %258 = vector.load %arg21[%c3_191, %c0_192, %c0_193] : memref<4x8x8xf32, #tpu.memory_space<vmem>>, vector<1x8x8xf32>
      %259 = vector.shape_cast %258 : vector<1x8x8xf32> to vector<8x8xf32>
      %260 = vector.shape_cast %257 : vector<8x8xf32> to vector<1x8x8xf32>
      tpu.vector_store %arg21[%c3_191, %c0_192, %c0_193], %260 {strides = array<i32>} : memref<4x8x8xf32, #tpu.memory_space<vmem>>, vector<1x8x8xf32>,
      %c3_194 = arith.constant 3 : index
      %c0_195 = arith.constant 0 : index
      %c0_196 = arith.constant 0 : index
      %261 = vector.load %arg8[%c3_194, %c0_195, %c0_196] : memref<4x32x8xf32, #tpu.memory_space<vmem>>, vector<1x32x8xf32>
      %262 = vector.shape_cast %261 : vector<1x32x8xf32> to vector<32x8xf32>
      %cst_197 = arith.constant dense<0.000000e+00> : vector<8x8xf32>
      %263 = tpu.matmul %190, %262, %cst_197 {dimension_numbers = #tpu.dot_dimension_numbers<[1], [0], [0], [1], [0, 0, 1, 1], [], []>} : vector<8x32xf32>, vector<32x8xf32>, vector<8x8xf32> -> vector<8x8xf32>
      %c3_198 = arith.constant 3 : index
      %c0_199 = arith.constant 0 : index
      %c0_200 = arith.constant 0 : index
      %264 = vector.load %arg9[%c3_198, %c0_199, %c0_200] : memref<4x1x8xf32, #tpu.memory_space<vmem>>, vector<1x1x8xf32>
      %265 = vector.shape_cast %264 : vector<1x1x8xf32> to vector<1x8xf32>
      %266 = vector.broadcast %265 : vector<1x8xf32> to vector<8x8xf32>
      %267 = arith.addf %263, %266 : vector<8x8xf32>
      %c3_201 = arith.constant 3 : index
      %c0_202 = arith.constant 0 : index
      %c0_203 = arith.constant 0 : index
      %268 = vector.load %arg22[%c3_201, %c0_202, %c0_203] : memref<4x8x8xf32, #tpu.memory_space<vmem>>, vector<1x8x8xf32>
      %269 = vector.shape_cast %268 : vector<1x8x8xf32> to vector<8x8xf32>
      %270 = vector.shape_cast %267 : vector<8x8xf32> to vector<1x8x8xf32>
      tpu.vector_store %arg22[%c3_201, %c0_202, %c0_203], %270 {strides = array<i32>} : memref<4x8x8xf32, #tpu.memory_space<vmem>>, vector<1x8x8xf32>,
    } else {
    }
    %c0 = arith.constant 0 : index
    %c0_1 = arith.constant 0 : index
    %c0_2 = arith.constant 0 : index
    %3 = vector.load %arg2[%c0, %c0_1, %c0_2] : memref<1x8x32xf32, #tpu.memory_space<vmem>>, vector<1x8x32xf32>
    %4 = vector.shape_cast %3 : vector<1x8x32xf32> to vector<8x32xf32>
    %c0_3 = arith.constant 0 : index
    %c0_4 = arith.constant 0 : index
    %5 = vector.load %arg11[%c0_3, %c0_4] : memref<1x32xf32, #tpu.memory_space<vmem>>, vector<1x32xf32>
    %6 = vector.shape_cast %5 : vector<1x32xf32> to vector<1x32xf32>
    %7 = vector.broadcast %6 : vector<1x32xf32> to vector<8x32xf32>
    %c0_5 = arith.constant 0 : index
    %c0_6 = arith.constant 0 : index
    %c0_7 = arith.constant 0 : index
    %8 = vector.load %arg4[%c0_5, %c0_6, %c0_7] : memref<4x32x8xf32, #tpu.memory_space<vmem>>, vector<1x32x8xf32>
    %9 = vector.shape_cast %8 : vector<1x32x8xf32> to vector<32x8xf32>
    %cst = arith.constant dense<0.000000e+00> : vector<8x8xf32>
    %10 = tpu.matmul %4, %9, %cst {dimension_numbers = #tpu.dot_dimension_numbers<[1], [0], [0], [1], [0, 0, 1, 1], [], []>} : vector<8x32xf32>, vector<32x8xf32>, vector<8x8xf32> -> vector<8x8xf32>
    %c0_8 = arith.constant 0 : index
    %c0_9 = arith.constant 0 : index
    %c0_10 = arith.constant 0 : index
    %11 = vector.load %arg5[%c0_8, %c0_9, %c0_10] : memref<4x1x8xf32, #tpu.memory_space<vmem>>, vector<1x1x8xf32>
    %12 = vector.shape_cast %11 : vector<1x1x8xf32> to vector<1x8xf32>
    %13 = vector.broadcast %12 : vector<1x8xf32> to vector<8x8xf32>
    %14 = arith.addf %10, %13 : vector<8x8xf32>
    %c0_11 = arith.constant 0 : index
    %c0_12 = arith.constant 0 : index
    %c0_13 = arith.constant 0 : index
    %15 = vector.load %arg21[%c0_11, %c0_12, %c0_13] : memref<4x8x8xf32, #tpu.memory_space<vmem>>, vector<1x8x8xf32>
    %16 = vector.shape_cast %15 : vector<1x8x8xf32> to vector<8x8xf32>
    %c0_14 = arith.constant 0 : index
    %c0_15 = arith.constant 0 : index
    %c0_16 = arith.constant 0 : index
    %17 = vector.load %arg22[%c0_14, %c0_15, %c0_16] : memref<4x8x8xf32, #tpu.memory_space<vmem>>, vector<1x8x8xf32>
    %18 = vector.shape_cast %17 : vector<1x8x8xf32> to vector<8x8xf32>
    %cst_17 = arith.constant dense<0.000000e+00> : vector<8x8xf32>
    %19 = tpu.matmul %14, %16, %cst_17 {dimension_numbers = #tpu.dot_dimension_numbers<[1], [1], [0], [0], [0, 0, 1, 0], [], []>} : vector<8x8xf32>, vector<8x8xf32>, vector<8x8xf32> -> vector<8x8xf32>
    %cst_18 = arith.constant 0.353553385 : f32
    %20 = vector.broadcast %cst_18 : f32 to vector<8x8xf32>
    %21 = arith.mulf %19, %20 : vector<8x8xf32>
    %cst_19 = arith.constant dense<0xFF800000> : vector<8xf32>
    %22 = vector.multi_reduction <maximumf>, %21, %cst_19 [1] : vector<8x8xf32> to vector<8xf32>
    %23 = vector.shape_cast %22 : vector<8xf32> to vector<8x1xf32>
    %24 = vector.broadcast %23 : vector<8x1xf32> to vector<8x8xf32>
    %25 = arith.subf %21, %24 : vector<8x8xf32>
    %26 = math.exp %25 : vector<8x8xf32>
    %cst_20 = arith.constant dense<0.000000e+00> : vector<8xf32>
    %27 = vector.multi_reduction <add>, %26, %cst_20 [1] : vector<8x8xf32> to vector<8xf32>
    %28 = vector.shape_cast %27 : vector<8xf32> to vector<8x1xf32>
    %29 = tpu.reciprocal %28 : vector<8x1xf32> -> vector<8x1xf32>
    %30 = vector.broadcast %29 : vector<8x1xf32> to vector<8x8xf32>
    %31 = arith.mulf %26, %30 : vector<8x8xf32>
    %cst_21 = arith.constant dense<0.000000e+00> : vector<8x8xf32>
    %32 = tpu.matmul %31, %18, %cst_21 {dimension_numbers = #tpu.dot_dimension_numbers<[1], [0], [0], [1], [0, 0, 1, 1], [], []>} : vector<8x8xf32>, vector<8x8xf32>, vector<8x8xf32> -> vector<8x8xf32>
    %c0_22 = arith.constant 0 : index
    %c0_23 = arith.constant 0 : index
    %c0_24 = arith.constant 0 : index
    %33 = vector.load %arg10[%c0_22, %c0_23, %c0_24] : memref<4x8x32xf32, #tpu.memory_space<vmem>>, vector<1x8x32xf32>
    %34 = vector.shape_cast %33 : vector<1x8x32xf32> to vector<8x32xf32>
    %cst_25 = arith.constant dense<0.000000e+00> : vector<8x32xf32>
    %35 = tpu.matmul %32, %34, %cst_25 {dimension_numbers = #tpu.dot_dimension_numbers<[1], [0], [0], [1], [0, 0, 1, 1], [], []>} : vector<8x8xf32>, vector<8x32xf32>, vector<8x32xf32> -> vector<8x32xf32>
    %36 = arith.addf %7, %35 : vector<8x32xf32>
    %c1 = arith.constant 1 : index
    %c0_26 = arith.constant 0 : index
    %c0_27 = arith.constant 0 : index
    %37 = vector.load %arg4[%c1, %c0_26, %c0_27] : memref<4x32x8xf32, #tpu.memory_space<vmem>>, vector<1x32x8xf32>
    %38 = vector.shape_cast %37 : vector<1x32x8xf32> to vector<32x8xf32>
    %cst_28 = arith.constant dense<0.000000e+00> : vector<8x8xf32>
    %39 = tpu.matmul %4, %38, %cst_28 {dimension_numbers = #tpu.dot_dimension_numbers<[1], [0], [0], [1], [0, 0, 1, 1], [], []>} : vector<8x32xf32>, vector<32x8xf32>, vector<8x8xf32> -> vector<8x8xf32>
    %c1_29 = arith.constant 1 : index
    %c0_30 = arith.constant 0 : index
    %c0_31 = arith.constant 0 : index
    %40 = vector.load %arg5[%c1_29, %c0_30, %c0_31] : memref<4x1x8xf32, #tpu.memory_space<vmem>>, vector<1x1x8xf32>
    %41 = vector.shape_cast %40 : vector<1x1x8xf32> to vector<1x8xf32>
    %42 = vector.broadcast %41 : vector<1x8xf32> to vector<8x8xf32>
    %43 = arith.addf %39, %42 : vector<8x8xf32>
    %c1_32 = arith.constant 1 : index
    %c0_33 = arith.constant 0 : index
    %c0_34 = arith.constant 0 : index
    %44 = vector.load %arg21[%c1_32, %c0_33, %c0_34] : memref<4x8x8xf32, #tpu.memory_space<vmem>>, vector<1x8x8xf32>
    %45 = vector.shape_cast %44 : vector<1x8x8xf32> to vector<8x8xf32>
    %c1_35 = arith.constant 1 : index
    %c0_36 = arith.constant 0 : index
    %c0_37 = arith.constant 0 : index
    %46 = vector.load %arg22[%c1_35, %c0_36, %c0_37] : memref<4x8x8xf32, #tpu.memory_space<vmem>>, vector<1x8x8xf32>
    %47 = vector.shape_cast %46 : vector<1x8x8xf32> to vector<8x8xf32>
    %cst_38 = arith.constant dense<0.000000e+00> : vector<8x8xf32>
    %48 = tpu.matmul %43, %45, %cst_38 {dimension_numbers = #tpu.dot_dimension_numbers<[1], [1], [0], [0], [0, 0, 1, 0], [], []>} : vector<8x8xf32>, vector<8x8xf32>, vector<8x8xf32> -> vector<8x8xf32>
    %cst_39 = arith.constant 0.353553385 : f32
    %49 = vector.broadcast %cst_39 : f32 to vector<8x8xf32>
    %50 = arith.mulf %48, %49 : vector<8x8xf32>
    %cst_40 = arith.constant dense<0xFF800000> : vector<8xf32>
    %51 = vector.multi_reduction <maximumf>, %50, %cst_40 [1] : vector<8x8xf32> to vector<8xf32>
    %52 = vector.shape_cast %51 : vector<8xf32> to vector<8x1xf32>
    %53 = vector.broadcast %52 : vector<8x1xf32> to vector<8x8xf32>
    %54 = arith.subf %50, %53 : vector<8x8xf32>
    %55 = math.exp %54 : vector<8x8xf32>
    %cst_41 = arith.constant dense<0.000000e+00> : vector<8xf32>
    %56 = vector.multi_reduction <add>, %55, %cst_41 [1] : vector<8x8xf32> to vector<8xf32>
    %57 = vector.shape_cast %56 : vector<8xf32> to vector<8x1xf32>
    %58 = tpu.reciprocal %57 : vector<8x1xf32> -> vector<8x1xf32>
    %59 = vector.broadcast %58 : vector<8x1xf32> to vector<8x8xf32>
    %60 = arith.mulf %55, %59 : vector<8x8xf32>
    %cst_42 = arith.constant dense<0.000000e+00> : vector<8x8xf32>
    %61 = tpu.matmul %60, %47, %cst_42 {dimension_numbers = #tpu.dot_dimension_numbers<[1], [0], [0], [1], [0, 0, 1, 1], [], []>} : vector<8x8xf32>, vector<8x8xf32>, vector<8x8xf32> -> vector<8x8xf32>
    %c1_43 = arith.constant 1 : index
    %c0_44 = arith.constant 0 : index
    %c0_45 = arith.constant 0 : index
    %62 = vector.load %arg10[%c1_43, %c0_44, %c0_45] : memref<4x8x32xf32, #tpu.memory_space<vmem>>, vector<1x8x32xf32>
    %63 = vector.shape_cast %62 : vector<1x8x32xf32> to vector<8x32xf32>
    %cst_46 = arith.constant dense<0.000000e+00> : vector<8x32xf32>
    %64 = tpu.matmul %61, %63, %cst_46 {dimension_numbers = #tpu.dot_dimension_numbers<[1], [0], [0], [1], [0, 0, 1, 1], [], []>} : vector<8x8xf32>, vector<8x32xf32>, vector<8x32xf32> -> vector<8x32xf32>
    %65 = arith.addf %36, %64 : vector<8x32xf32>
    %c2 = arith.constant 2 : index
    %c0_47 = arith.constant 0 : index
    %c0_48 = arith.constant 0 : index
    %66 = vector.load %arg4[%c2, %c0_47, %c0_48] : memref<4x32x8xf32, #tpu.memory_space<vmem>>, vector<1x32x8xf32>
    %67 = vector.shape_cast %66 : vector<1x32x8xf32> to vector<32x8xf32>
    %cst_49 = arith.constant dense<0.000000e+00> : vector<8x8xf32>
    %68 = tpu.matmul %4, %67, %cst_49 {dimension_numbers = #tpu.dot_dimension_numbers<[1], [0], [0], [1], [0, 0, 1, 1], [], []>} : vector<8x32xf32>, vector<32x8xf32>, vector<8x8xf32> -> vector<8x8xf32>
    %c2_50 = arith.constant 2 : index
    %c0_51 = arith.constant 0 : index
    %c0_52 = arith.constant 0 : index
    %69 = vector.load %arg5[%c2_50, %c0_51, %c0_52] : memref<4x1x8xf32, #tpu.memory_space<vmem>>, vector<1x1x8xf32>
    %70 = vector.shape_cast %69 : vector<1x1x8xf32> to vector<1x8xf32>
    %71 = vector.broadcast %70 : vector<1x8xf32> to vector<8x8xf32>
    %72 = arith.addf %68, %71 : vector<8x8xf32>
    %c2_53 = arith.constant 2 : index
    %c0_54 = arith.constant 0 : index
    %c0_55 = arith.constant 0 : index
    %73 = vector.load %arg21[%c2_53, %c0_54, %c0_55] : memref<4x8x8xf32, #tpu.memory_space<vmem>>, vector<1x8x8xf32>
    %74 = vector.shape_cast %73 : vector<1x8x8xf32> to vector<8x8xf32>
    %c2_56 = arith.constant 2 : index
    %c0_57 = arith.constant 0 : index
    %c0_58 = arith.constant 0 : index
    %75 = vector.load %arg22[%c2_56, %c0_57, %c0_58] : memref<4x8x8xf32, #tpu.memory_space<vmem>>, vector<1x8x8xf32>
    %76 = vector.shape_cast %75 : vector<1x8x8xf32> to vector<8x8xf32>
    %cst_59 = arith.constant dense<0.000000e+00> : vector<8x8xf32>
    %77 = tpu.matmul %72, %74, %cst_59 {dimension_numbers = #tpu.dot_dimension_numbers<[1], [1], [0], [0], [0, 0, 1, 0], [], []>} : vector<8x8xf32>, vector<8x8xf32>, vector<8x8xf32> -> vector<8x8xf32>
    %cst_60 = arith.constant 0.353553385 : f32
    %78 = vector.broadcast %cst_60 : f32 to vector<8x8xf32>
    %79 = arith.mulf %77, %78 : vector<8x8xf32>
    %cst_61 = arith.constant dense<0xFF800000> : vector<8xf32>
    %80 = vector.multi_reduction <maximumf>, %79, %cst_61 [1] : vector<8x8xf32> to vector<8xf32>
    %81 = vector.shape_cast %80 : vector<8xf32> to vector<8x1xf32>
    %82 = vector.broadcast %81 : vector<8x1xf32> to vector<8x8xf32>
    %83 = arith.subf %79, %82 : vector<8x8xf32>
    %84 = math.exp %83 : vector<8x8xf32>
    %cst_62 = arith.constant dense<0.000000e+00> : vector<8xf32>
    %85 = vector.multi_reduction <add>, %84, %cst_62 [1] : vector<8x8xf32> to vector<8xf32>
    %86 = vector.shape_cast %85 : vector<8xf32> to vector<8x1xf32>
    %87 = tpu.reciprocal %86 : vector<8x1xf32> -> vector<8x1xf32>
    %88 = vector.broadcast %87 : vector<8x1xf32> to vector<8x8xf32>
    %89 = arith.mulf %84, %88 : vector<8x8xf32>
    %cst_63 = arith.constant dense<0.000000e+00> : vector<8x8xf32>
    %90 = tpu.matmul %89, %76, %cst_63 {dimension_numbers = #tpu.dot_dimension_numbers<[1], [0], [0], [1], [0, 0, 1, 1], [], []>} : vector<8x8xf32>, vector<8x8xf32>, vector<8x8xf32> -> vector<8x8xf32>
    %c2_64 = arith.constant 2 : index
    %c0_65 = arith.constant 0 : index
    %c0_66 = arith.constant 0 : index
    %91 = vector.load %arg10[%c2_64, %c0_65, %c0_66] : memref<4x8x32xf32, #tpu.memory_space<vmem>>, vector<1x8x32xf32>
    %92 = vector.shape_cast %91 : vector<1x8x32xf32> to vector<8x32xf32>
    %cst_67 = arith.constant dense<0.000000e+00> : vector<8x32xf32>
    %93 = tpu.matmul %90, %92, %cst_67 {dimension_numbers = #tpu.dot_dimension_numbers<[1], [0], [0], [1], [0, 0, 1, 1], [], []>} : vector<8x8xf32>, vector<8x32xf32>, vector<8x32xf32> -> vector<8x32xf32>
    %94 = arith.addf %65, %93 : vector<8x32xf32>
    %c3 = arith.constant 3 : index
    %c0_68 = arith.constant 0 : index
    %c0_69 = arith.constant 0 : index
    %95 = vector.load %arg4[%c3, %c0_68, %c0_69] : memref<4x32x8xf32, #tpu.memory_space<vmem>>, vector<1x32x8xf32>
    %96 = vector.shape_cast %95 : vector<1x32x8xf32> to vector<32x8xf32>
    %cst_70 = arith.constant dense<0.000000e+00> : vector<8x8xf32>
    %97 = tpu.matmul %4, %96, %cst_70 {dimension_numbers = #tpu.dot_dimension_numbers<[1], [0], [0], [1], [0, 0, 1, 1], [], []>} : vector<8x32xf32>, vector<32x8xf32>, vector<8x8xf32> -> vector<8x8xf32>
    %c3_71 = arith.constant 3 : index
    %c0_72 = arith.constant 0 : index
    %c0_73 = arith.constant 0 : index
    %98 = vector.load %arg5[%c3_71, %c0_72, %c0_73] : memref<4x1x8xf32, #tpu.memory_space<vmem>>, vector<1x1x8xf32>
    %99 = vector.shape_cast %98 : vector<1x1x8xf32> to vector<1x8xf32>
    %100 = vector.broadcast %99 : vector<1x8xf32> to vector<8x8xf32>
    %101 = arith.addf %97, %100 : vector<8x8xf32>
    %c3_74 = arith.constant 3 : index
    %c0_75 = arith.constant 0 : index
    %c0_76 = arith.constant 0 : index
    %102 = vector.load %arg21[%c3_74, %c0_75, %c0_76] : memref<4x8x8xf32, #tpu.memory_space<vmem>>, vector<1x8x8xf32>
    %103 = vector.shape_cast %102 : vector<1x8x8xf32> to vector<8x8xf32>
    %c3_77 = arith.constant 3 : index
    %c0_78 = arith.constant 0 : index
    %c0_79 = arith.constant 0 : index
    %104 = vector.load %arg22[%c3_77, %c0_78, %c0_79] : memref<4x8x8xf32, #tpu.memory_space<vmem>>, vector<1x8x8xf32>
    %105 = vector.shape_cast %104 : vector<1x8x8xf32> to vector<8x8xf32>
    %cst_80 = arith.constant dense<0.000000e+00> : vector<8x8xf32>
    %106 = tpu.matmul %101, %103, %cst_80 {dimension_numbers = #tpu.dot_dimension_numbers<[1], [1], [0], [0], [0, 0, 1, 0], [], []>} : vector<8x8xf32>, vector<8x8xf32>, vector<8x8xf32> -> vector<8x8xf32>
    %cst_81 = arith.constant 0.353553385 : f32
    %107 = vector.broadcast %cst_81 : f32 to vector<8x8xf32>
    %108 = arith.mulf %106, %107 : vector<8x8xf32>
    %cst_82 = arith.constant dense<0xFF800000> : vector<8xf32>
    %109 = vector.multi_reduction <maximumf>, %108, %cst_82 [1] : vector<8x8xf32> to vector<8xf32>
    %110 = vector.shape_cast %109 : vector<8xf32> to vector<8x1xf32>
    %111 = vector.broadcast %110 : vector<8x1xf32> to vector<8x8xf32>
    %112 = arith.subf %108, %111 : vector<8x8xf32>
    %113 = math.exp %112 : vector<8x8xf32>
    %cst_83 = arith.constant dense<0.000000e+00> : vector<8xf32>
    %114 = vector.multi_reduction <add>, %113, %cst_83 [1] : vector<8x8xf32> to vector<8xf32>
    %115 = vector.shape_cast %114 : vector<8xf32> to vector<8x1xf32>
    %116 = tpu.reciprocal %115 : vector<8x1xf32> -> vector<8x1xf32>
    %117 = vector.broadcast %116 : vector<8x1xf32> to vector<8x8xf32>
    %118 = arith.mulf %113, %117 : vector<8x8xf32>
    %cst_84 = arith.constant dense<0.000000e+00> : vector<8x8xf32>
    %119 = tpu.matmul %118, %105, %cst_84 {dimension_numbers = #tpu.dot_dimension_numbers<[1], [0], [0], [1], [0, 0, 1, 1], [], []>} : vector<8x8xf32>, vector<8x8xf32>, vector<8x8xf32> -> vector<8x8xf32>
    %c3_85 = arith.constant 3 : index
    %c0_86 = arith.constant 0 : index
    %c0_87 = arith.constant 0 : index
    %120 = vector.load %arg10[%c3_85, %c0_86, %c0_87] : memref<4x8x32xf32, #tpu.memory_space<vmem>>, vector<1x8x32xf32>
    %121 = vector.shape_cast %120 : vector<1x8x32xf32> to vector<8x32xf32>
    %cst_88 = arith.constant dense<0.000000e+00> : vector<8x32xf32>
    %122 = tpu.matmul %119, %121, %cst_88 {dimension_numbers = #tpu.dot_dimension_numbers<[1], [0], [0], [1], [0, 0, 1, 1], [], []>} : vector<8x8xf32>, vector<8x32xf32>, vector<8x32xf32> -> vector<8x32xf32>
    %123 = arith.addf %94, %122 : vector<8x32xf32>
    %124 = arith.addf %4, %123 : vector<8x32xf32>
    %c0_89 = arith.constant 0 : index
    %c0_90 = arith.constant 0 : index
    %125 = vector.load %arg16[%c0_89, %c0_90] : memref<1x32xf32, #tpu.memory_space<vmem>>, vector<1x32xf32>
    %c0_91 = arith.constant 0 : index
    %c0_92 = arith.constant 0 : index
    %126 = vector.load %arg17[%c0_91, %c0_92] : memref<1x32xf32, #tpu.memory_space<vmem>>, vector<1x32xf32>
    %cst_93 = arith.constant dense<0.000000e+00> : vector<8xf32>
    %127 = vector.multi_reduction <add>, %124, %cst_93 [1] : vector<8x32xf32> to vector<8xf32>
    %128 = vector.shape_cast %127 : vector<8xf32> to vector<8x1xf32>
    %cst_94 = arith.constant 3.200000e+01 : f32
    %129 = vector.broadcast %cst_94 : f32 to vector<8x1xf32>
    %130 = arith.divf %128, %129 : vector<8x1xf32>
    %131 = vector.broadcast %130 : vector<8x1xf32> to vector<8x32xf32>
    %132 = arith.subf %124, %131 : vector<8x32xf32>
    %133 = arith.mulf %132, %132 : vector<8x32xf32>
    %cst_95 = arith.constant dense<0.000000e+00> : vector<8xf32>
    %134 = vector.multi_reduction <add>, %133, %cst_95 [1] : vector<8x32xf32> to vector<8xf32>
    %135 = vector.shape_cast %134 : vector<8xf32> to vector<8x1xf32>
    %cst_96 = arith.constant 3.200000e+01 : f32
    %136 = vector.broadcast %cst_96 : f32 to vector<8x1xf32>
    %137 = arith.divf %135, %136 : vector<8x1xf32>
    %138 = vector.broadcast %130 : vector<8x1xf32> to vector<8x32xf32>
    %139 = arith.subf %124, %138 : vector<8x32xf32>
    %cst_97 = arith.constant 9.99999996E-13 : f32
    %140 = vector.broadcast %cst_97 : f32 to vector<8x1xf32>
    %141 = arith.addf %137, %140 : vector<8x1xf32>
    %142 = math.sqrt %141 : vector<8x1xf32>
    %143 = vector.broadcast %142 : vector<8x1xf32> to vector<8x32xf32>
    %144 = arith.divf %139, %143 : vector<8x32xf32>
    %145 = vector.broadcast %125 : vector<1x32xf32> to vector<8x32xf32>
    %146 = arith.mulf %145, %144 : vector<8x32xf32>
    %147 = vector.broadcast %126 : vector<1x32xf32> to vector<8x32xf32>
    %148 = arith.addf %146, %147 : vector<8x32xf32>
    %c0_98 = arith.constant 0 : index
    %c0_99 = arith.constant 0 : index
    %149 = vector.load %arg12[%c0_98, %c0_99] : memref<32x64xf32, #tpu.memory_space<vmem>>, vector<32x64xf32>
    %cst_100 = arith.constant dense<0.000000e+00> : vector<8x64xf32>
    %150 = tpu.matmul %148, %149, %cst_100 {dimension_numbers = #tpu.dot_dimension_numbers<[1], [0], [0], [1], [0, 0, 1, 1], [], []>} : vector<8x32xf32>, vector<32x64xf32>, vector<8x64xf32> -> vector<8x64xf32>
    %c0_101 = arith.constant 0 : index
    %c0_102 = arith.constant 0 : index
    %151 = vector.load %arg13[%c0_101, %c0_102] : memref<1x64xf32, #tpu.memory_space<vmem>>, vector<1x64xf32>
    %152 = vector.broadcast %151 : vector<1x64xf32> to vector<8x64xf32>
    %153 = arith.addf %150, %152 : vector<8x64xf32>
    %cst_103 = arith.constant 0.000000e+00 : f32
    %154 = vector.broadcast %cst_103 : f32 to vector<8x64xf32>
    %155 = arith.maximumf %153, %154 : vector<8x64xf32>
    %c0_104 = arith.constant 0 : index
    %c0_105 = arith.constant 0 : index
    %156 = vector.load %arg14[%c0_104, %c0_105] : memref<64x32xf32, #tpu.memory_space<vmem>>, vector<64x32xf32>
    %cst_106 = arith.constant dense<0.000000e+00> : vector<8x32xf32>
    %157 = tpu.matmul %155, %156, %cst_106 {dimension_numbers = #tpu.dot_dimension_numbers<[1], [0], [0], [1], [0, 0, 1, 1], [], []>} : vector<8x64xf32>, vector<64x32xf32>, vector<8x32xf32> -> vector<8x32xf32>
    %c0_107 = arith.constant 0 : index
    %c0_108 = arith.constant 0 : index
    %158 = vector.load %arg15[%c0_107, %c0_108] : memref<1x32xf32, #tpu.memory_space<vmem>>, vector<1x32xf32>
    %159 = vector.broadcast %158 : vector<1x32xf32> to vector<8x32xf32>
    %160 = arith.addf %157, %159 : vector<8x32xf32>
    %161 = arith.addf %124, %160 : vector<8x32xf32>
    %c0_109 = arith.constant 0 : index
    %c0_110 = arith.constant 0 : index
    %162 = vector.load %arg18[%c0_109, %c0_110] : memref<1x32xf32, #tpu.memory_space<vmem>>, vector<1x32xf32>
    %c0_111 = arith.constant 0 : index
    %c0_112 = arith.constant 0 : index
    %163 = vector.load %arg19[%c0_111, %c0_112] : memref<1x32xf32, #tpu.memory_space<vmem>>, vector<1x32xf32>
    %cst_113 = arith.constant dense<0.000000e+00> : vector<8xf32>
    %164 = vector.multi_reduction <add>, %161, %cst_113 [1] : vector<8x32xf32> to vector<8xf32>
    %165 = vector.shape_cast %164 : vector<8xf32> to vector<8x1xf32>
    %cst_114 = arith.constant 3.200000e+01 : f32
    %166 = vector.broadcast %cst_114 : f32 to vector<8x1xf32>
    %167 = arith.divf %165, %166 : vector<8x1xf32>
    %168 = vector.broadcast %167 : vector<8x1xf32> to vector<8x32xf32>
    %169 = arith.subf %161, %168 : vector<8x32xf32>
    %170 = arith.mulf %169, %169 : vector<8x32xf32>
    %cst_115 = arith.constant dense<0.000000e+00> : vector<8xf32>
    %171 = vector.multi_reduction <add>, %170, %cst_115 [1] : vector<8x32xf32> to vector<8xf32>
    %172 = vector.shape_cast %171 : vector<8xf32> to vector<8x1xf32>
    %cst_116 = arith.constant 3.200000e+01 : f32
    %173 = vector.broadcast %cst_116 : f32 to vector<8x1xf32>
    %174 = arith.divf %172, %173 : vector<8x1xf32>
    %175 = vector.broadcast %167 : vector<8x1xf32> to vector<8x32xf32>
    %176 = arith.subf %161, %175 : vector<8x32xf32>
    %cst_117 = arith.constant 9.99999996E-13 : f32
    %177 = vector.broadcast %cst_117 : f32 to vector<8x1xf32>
    %178 = arith.addf %174, %177 : vector<8x1xf32>
    %179 = math.sqrt %178 : vector<8x1xf32>
    %180 = vector.broadcast %179 : vector<8x1xf32> to vector<8x32xf32>
    %181 = arith.divf %176, %180 : vector<8x32xf32>
    %182 = vector.broadcast %162 : vector<1x32xf32> to vector<8x32xf32>
    %183 = arith.mulf %182, %181 : vector<8x32xf32>
    %184 = vector.broadcast %163 : vector<1x32xf32> to vector<8x32xf32>
    %185 = arith.addf %183, %184 : vector<8x32xf32>
    %c0_118 = arith.constant 0 : index
    %c0_119 = arith.constant 0 : index
    %c0_120 = arith.constant 0 : index
    %186 = vector.load %arg20[%c0_118, %c0_119, %c0_120] : memref<1x8x32xf32, #tpu.memory_space<vmem>>, vector<1x8x32xf32>
    %187 = vector.shape_cast %186 : vector<1x8x32xf32> to vector<8x32xf32>
    %188 = vector.shape_cast %185 : vector<8x32xf32> to vector<1x8x32xf32>
    tpu.vector_store %arg20[%c0_118, %c0_119, %c0_120], %188 {strides = array<i32>} : memref<1x8x32xf32, #tpu.memory_space<vmem>>, vector<1x8x32xf32>,
    return
  }
  func.func @transform_0(%arg0: i32, %arg1: i32) -> (i32, i32, i32) {
    %c0_i32 = arith.constant 0 : i32
    %c0_i32_0 = arith.constant 0 : i32
    return %arg0, %arg1, %c0_i32 : i32, i32, i32
  }
  func.func @transform_1(%arg0: i32, %arg1: i32) -> (i32, i32, i32) {
    %c0_i32 = arith.constant 0 : i32
    %c0_i32_0 = arith.constant 0 : i32
    %c0_i32_1 = arith.constant 0 : i32
    return %arg0, %c0_i32, %c0_i32_0 : i32, i32, i32
  }
  func.func @transform_2(%arg0: i32, %arg1: i32) -> (i32, i32, i32) {
    %c0_i32 = arith.constant 0 : i32
    %c0_i32_0 = arith.constant 0 : i32
    %c0_i32_1 = arith.constant 0 : i32
    %c0_i32_2 = arith.constant 0 : i32
    return %c0_i32, %c0_i32_0, %c0_i32_1 : i32, i32, i32
  }
  func.func @transform_3(%arg0: i32, %arg1: i32) -> (i32, i32, i32) {
    %c0_i32 = arith.constant 0 : i32
    %c0_i32_0 = arith.constant 0 : i32
    %c0_i32_1 = arith.constant 0 : i32
    %c0_i32_2 = arith.constant 0 : i32
    return %c0_i32, %c0_i32_0, %c0_i32_1 : i32, i32, i32
  }
  func.func @transform_4(%arg0: i32, %arg1: i32) -> (i32, i32, i32) {
    %c0_i32 = arith.constant 0 : i32
    %c0_i32_0 = arith.constant 0 : i32
    %c0_i32_1 = arith.constant 0 : i32
    %c0_i32_2 = arith.constant 0 : i32
    return %c0_i32, %c0_i32_0, %c0_i32_1 : i32, i32, i32
  }
  func.func @transform_5(%arg0: i32, %arg1: i32) -> (i32, i32, i32) {
    %c0_i32 = arith.constant 0 : i32
    %c0_i32_0 = arith.constant 0 : i32
    %c0_i32_1 = arith.constant 0 : i32
    %c0_i32_2 = arith.constant 0 : i32
    return %c0_i32, %c0_i32_0, %c0_i32_1 : i32, i32, i32
  }
  func.func @transform_6(%arg0: i32, %arg1: i32) -> (i32, i32, i32) {
    %c0_i32 = arith.constant 0 : i32
    %c0_i32_0 = arith.constant 0 : i32
    %c0_i32_1 = arith.constant 0 : i32
    %c0_i32_2 = arith.constant 0 : i32
    return %c0_i32, %c0_i32_0, %c0_i32_1 : i32, i32, i32
  }
  func.func @transform_7(%arg0: i32, %arg1: i32) -> (i32, i32, i32) {
    %c0_i32 = arith.constant 0 : i32
    %c0_i32_0 = arith.constant 0 : i32
    %c0_i32_1 = arith.constant 0 : i32
    %c0_i32_2 = arith.constant 0 : i32
    return %c0_i32, %c0_i32_0, %c0_i32_1 : i32, i32, i32
  }
  func.func @transform_8(%arg0: i32, %arg1: i32) -> (i32, i32, i32) {
    %c0_i32 = arith.constant 0 : i32
    %c0_i32_0 = arith.constant 0 : i32
    %c0_i32_1 = arith.constant 0 : i32
    %c0_i32_2 = arith.constant 0 : i32
    return %c0_i32, %c0_i32_0, %c0_i32_1 : i32, i32, i32
  }
  func.func @transform_9(%arg0: i32, %arg1: i32) -> (i32, i32) {
    %c0_i32 = arith.constant 0 : i32
    %c0_i32_0 = arith.constant 0 : i32
    %c0_i32_1 = arith.constant 0 : i32
    return %c0_i32, %c0_i32_0 : i32, i32
  }
  func.func @transform_10(%arg0: i32, %arg1: i32) -> (i32, i32) {
    %c0_i32 = arith.constant 0 : i32
    %c0_i32_0 = arith.constant 0 : i32
    %c0_i32_1 = arith.constant 0 : i32
    return %c0_i32, %c0_i32_0 : i32, i32
  }
  func.func @transform_11(%arg0: i32, %arg1: i32) -> (i32, i32) {
    %c0_i32 = arith.constant 0 : i32
    %c0_i32_0 = arith.constant 0 : i32
    %c0_i32_1 = arith.constant 0 : i32
    return %c0_i32, %c0_i32_0 : i32, i32
  }
  func.func @transform_12(%arg0: i32, %arg1: i32) -> (i32, i32) {
    %c0_i32 = arith.constant 0 : i32
    %c0_i32_0 = arith.constant 0 : i32
    %c0_i32_1 = arith.constant 0 : i32
    return %c0_i32, %c0_i32_0 : i32, i32
  }
  func.func @transform_13(%arg0: i32, %arg1: i32) -> (i32, i32) {
    %c0_i32 = arith.constant 0 : i32
    %c0_i32_0 = arith.constant 0 : i32
    %c0_i32_1 = arith.constant 0 : i32
    return %c0_i32, %c0_i32_0 : i32, i32
  }
  func.func @transform_14(%arg0: i32, %arg1: i32) -> (i32, i32) {
    %c0_i32 = arith.constant 0 : i32
    %c0_i32_0 = arith.constant 0 : i32
    %c0_i32_1 = arith.constant 0 : i32
    return %c0_i32, %c0_i32_0 : i32, i32
  }
  func.func @transform_15(%arg0: i32, %arg1: i32) -> (i32, i32) {
    %c0_i32 = arith.constant 0 : i32
    %c0_i32_0 = arith.constant 0 : i32
    %c0_i32_1 = arith.constant 0 : i32
    return %c0_i32, %c0_i32_0 : i32, i32
  }
  func.func @transform_16(%arg0: i32, %arg1: i32) -> (i32, i32) {
    %c0_i32 = arith.constant 0 : i32
    %c0_i32_0 = arith.constant 0 : i32
    %c0_i32_1 = arith.constant 0 : i32
    return %c0_i32, %c0_i32_0 : i32, i32
  }
  func.func @transform_17(%arg0: i32, %arg1: i32) -> (i32, i32) {
    %c0_i32 = arith.constant 0 : i32
    %c0_i32_0 = arith.constant 0 : i32
    %c0_i32_1 = arith.constant 0 : i32
    return %c0_i32, %c0_i32_0 : i32, i32
  }
  func.func @transform_18(%arg0: i32, %arg1: i32) -> (i32, i32, i32) {
    %c0_i32 = arith.constant 0 : i32
    %c0_i32_0 = arith.constant 0 : i32
    return %arg0, %arg1, %c0_i32 : i32, i32, i32
  }
}

</mosaic_0001>

<bundles_post_ra>
// kernel: tpu_custom_call.1
= control target key start
LH: loop header
LB: loop body
LE: loop exit
PB: predicated region body
PF: predicated region fallthrough
CT: control target
= control target key end

     0   :  { %s4189_s0 = inlined_call_operand.vmem [shape: f32[2,8,32], index: 0, kind: input, shape index: {}]   ;;  %s4190_s1 = inlined_call_operand.vmem [shape: f32[2,8,32], index: 1, kind: input, shape index: {}]   ;;  %s4191_s2 = inlined_call_operand.vmem [shape: f32[4,32,8], index: 2, kind: input, shape index: {}]   ;;  %s4192_s3 = inlined_call_operand.vmem [shape: f32[4,1,8], index: 3, kind: input, shape index: {}]   ;;  %s4193_s4 = inlined_call_operand.vmem [shape: f32[4,32,8], index: 4, kind: input, shape index: {}]   ;;  %s4194_s5 = inlined_call_operand.vmem [shape: f32[4,1,8], index: 5, kind: input, shape index: {}]   ;;  %s4195_s6 = inlined_call_operand.vmem [shape: f32[4,32,8], index: 6, kind: input, shape index: {}]   ;;  %s4196_s7 = inlined_call_operand.vmem [shape: f32[4,1,8], index: 7, kind: input, shape index: {}]   ;;  %s4197_s8 = inlined_call_operand.vmem [shape: f32[4,8,32], index: 8, kind: input, shape index: {}]   ;;  %s4198_s9 = inlined_call_operand.vmem [shape: f32[1,32], index: 9, kind: input, shape index: {}]   ;;  %s4199_s10 = inlined_call_operand.vmem [shape: f32[32,64], index: 10, kind: input, shape index: {}]   ;;  %s4200_s11 = inlined_call_operand.vmem [shape: f32[1,64], index: 11, kind: input, shape index: {}]   ;;  %s4201_s12 = inlined_call_operand.vmem [shape: f32[64,32], index: 12, kind: input, shape index: {}]   ;;  %s4202_s13 = inlined_call_operand.vmem [shape: f32[1,32], index: 13, kind: input, shape index: {}]   ;;  %s4203_s14 = inlined_call_operand.vmem [shape: f32[1,32], index: 14, kind: input, shape index: {}]   ;;  %s4204_s15 = inlined_call_operand.vmem [shape: f32[1,32], index: 15, kind: input, shape index: {}]   ;;  %s4205_s16 = inlined_call_operand.vmem [shape: f32[1,32], index: 16, kind: input, shape index: {}]   ;;  %s4206_s17 = inlined_call_operand.vmem [shape: f32[1,32], index: 17, kind: input, shape index: {}]   ;;  %s4207_s18 = inlined_call_operand.hbm [shape: f32[2,8,32], index: 18, kind: output, shape index: {}]  }
   0x1   :  { %4213 = sst [smem:[#allocation12_spill]] %s4189_s0 }
   0x2   :  { %4214 = sst [smem:[#allocation13_spill]] %s4190_s1 }
   0x3   :  { %4215 = sst [smem:[#allocation14_spill]] %s4191_s2 }
   0x4   :  { %4216 = sst [smem:[#allocation15_spill]] %s4192_s3 }
   0x5   :  { %4217 = sst [smem:[#allocation16_spill]] %s4193_s4 }
   0x6   :  { %4218 = sst [smem:[#allocation17_spill]] %s4194_s5 }
   0x7   :  { %4219 = sst [smem:[#allocation18_spill]] %s4195_s6 }
   0x8   :  { %23 = vsyncpa [#allocation5], 0 }
   0x9   :  { %25 = vsyncpa [#allocation5 + $0x1], 0  ;;  %s3635_s27 = smov 0   ;;  %s3637_s28 = smov 0  }
   0xa   :  { %s3639_s29 = smov 0   ;;  %s3641_s30 = smov 0  }
   0xb   :  { %s3643_s0 = smov 0   ;;  %s3645_s19 = smov 0  }
   0xc LB: > { %4220 = sst [smem:[#allocation7_spill]] %s3523_s29  ;;  %s2949_s1 = sadd.s32 4294967295, %s3535_s19   ;;  %s3535_s19 = sphi %s3645_s19, %s31_s19   ;;  %s3531_s0 = sphi %s3643_s0, %s4238_s0   ;;  %s3527_s30 = sphi %s3641_s30, %s4237_s30   ;;  %s3523_s29 = sphi %s3639_s29, %s4236_s29   ;;  %s3519_s28 = sphi %s3637_s28, %s4240_s28   ;;  %s3515_s27 = sphi %s3635_s27, %s4239_s27  }
   0xd   : > { %4221 = sst [smem:[#allocation8_spill]] %s3531_s0  ;;  %s2950_s20 = sadd.s32 4294967294, %s3535_s19  }
   0xe   : > { %s43_s21 = sadd.s32 1, %s3531_s0  ;;  %s442_s22 = sadd.s32 1, %s3523_s29 }
   0xf   : > { %p45_p0 = scmp.ge.s32.totalorder %s43_s21, 2  ;;  %p452_p1 = scmp.ne.s32.totalorder %s3523_s29, %s3519_s28 }
  0x10   : > { %p453_p2 = scmp.eq.s32.totalorder %s2949_s1, 1  ;;  %p458_p3 = scmp.ne.s32.totalorder %s3519_s28, %s3515_s27 }
  0x11   : > { %s4242_s21 = smov (%p45_p0, %s43_s21), 0  ;;  %p459_p5 = scmp.eq.s32.totalorder %s2950_s20, 1 }
  0x12   : > { %4222 = sst [smem:[#allocation9_spill]] %s4242_s21  ;;  %p3675_p4 = por %p453_p2, %p452_p1 }
  0x13   : > { %s437_s23 = ssub.s32 %s3531_s0, %s4242_s21  ;;  %p2953_p6 = scmp.ge.s32.totalorder %s3535_s19, 1 }
  0x14   : > { %p440_p7 = scmp.eq.s32.totalorder %s437_s23, 0  ;;  %p3682_p8 = por %p459_p5, %p458_p3 }
  0x15   : > { %p542_p9 = scmp.lt.s32.totalorder %s3535_s19, 3 }
  0x16   : > { %s4224_s24 = scalar_select %p3682_p8, 1, 0 }
  0x17   : > { %s3688_s25 = scalar_select %p440_p7, %s3523_s29, %s442_s22  }
  0x18   : > { %4225 = sst [smem:[#allocation10_spill]] %s4224_s24  ;;  %p543_p10 = pnand %p2953_p6, %p542_p9 }
  0x19   : > { %4226 = sst [smem:[#allocation11_spill]] %s3688_s25  ;;  %p602_p11 = scmp.lt.s32.totalorder (!%p543_p10), %s3527_s30, 1 }
  0x1a   : > { %546 = sbr.rel (%p543_p10) target bundleno = 4353 (0x1101), region = 92  ;;  %s4227_s4 = sld [smem:[#allocation16_spill]] (!%p543_p10) }
  0x1b   : > { %s4228_s29 = sld [smem:[#allocation13_spill]] (!%p543_p10)  ;;  %s3055_s23 = sshll.u32 (!%p543_p10), %s3527_s30, 7 }
  0x1c   : > { %s4229_s21 = sld [smem:[#allocation14_spill]] (!%p543_p10)  ;;  %s3539_s25 = smov (!%p543_p10), [#allocation4]  }
  0x1d   : > { %s4230_s1 = sld [smem:[#allocation12_spill]] (!%p543_p10)  ;;  %s3463_s26 = sshll.u32 (!%p543_p10), %s3539_s25, 4  ;;  %s3464_s26 = int_to_ptr.vmem [resolvable:$false] %s3463_s26 }
  0x1e   : > { %s4231_s5 = sld [smem:[#allocation17_spill]] (!%p543_p10) }
  0x1f   : > { %v3537_v1 = vmov 0.0   ;;  %vm3538_vm0 = vmmov 0   ;;  %s3701_s22 = scalar_select %p602_p11, %s3527_s30, 1  ;;  %vm629_vm1 = vcmask 261120   ;;  %vm703_vm2 = vcmask 64512  }
  0x20   : > { %v621_v0 = vld [vmem:[%s4227_s4 + $0x18] sm:$0xff]  ;;  %3156 = vmatprep.subr.mxu0 %v3537_v1  ;;  %v620_v2 = vld [vmem:[%s4227_s4 + $0x10] sm:$0xff]  ;;  %3164 = vmatprep.mubr.msk.f32.mxu0 %vm3538_vm0, %v3537_v1  ;;  %v619_v3 = vld [vmem:[%s4227_s4 + $0x8] sm:$0xff]  ;;  %s4232_s3 = sld [smem:[#allocation15_spill]]  ;;  %vm2739_vm5 = vcmask 523264   ;;  %s3465_s30 = scalar_lea.vmem %s3464_s26, 256 }
  0x21   : > { %3157 = vmatpush3.msra.mxu0 %v621_v0  ;;  %3167 = vmatprep.subr.mxu1 %v3537_v1  ;;  %s2955_s20 = sshll.u32 %s3701_s22, 3  ;;  %v618_v4 = vld [vmem:[%s4227_s4] sm:$0xff]  ;;  %v2964_v6 = vld [vmem:[%s4227_s4 + $0x38] sm:$0xff]  ;;  %v2963_v7 = vld [vmem:[%s4227_s4 + $0x30] sm:$0xff]  ;;  %s4233_s6 = sld [smem:[#allocation18_spill]] }
  0x22   : > { %3158 = vmatprep.subr.mxu0 %v3537_v1  ;;  %3175 = vmatprep.mubr.msk.f32.mxu1 %vm3538_vm0, %v3537_v1  ;;  %s612_s24 = scalar_lea.vmem %s4228_s29, %s2955_s20  ;;  %v2962_v8 = vld [vmem:[%s4227_s4 + $0x28] sm:$0xff]  ;;  %v2961_v9 = vld [vmem:[%s4227_s4 + $0x20] sm:$0xff]  ;;  %v2978_v10 = vld [vmem:[%s4227_s4 + $0x58] sm:$0xff] }
  0x23   : > { %3159 = vmatpush3.msra.mxu0 %v620_v2  ;;  %v3720_v5 = vld [vmem:[%s612_s24] sm:$0xff]  ;;  %v2977_v11 = vld [vmem:[%s4227_s4 + $0x50] sm:$0xff]  ;;  %v2976_v12 = vld [vmem:[%s4227_s4 + $0x48] sm:$0xff] }
  0x24   : > { %3160 = vmatprep.subr.mxu0 %v3537_v1  ;;  %v2975_v13 = vld [vmem:[%s4227_s4 + $0x40] sm:$0xff]  ;;  %v2992_v14 = vld [vmem:[%s4227_s4 + $0x78] sm:$0xff]  ;;  %v2991_v15 = vld [vmem:[%s4227_s4 + $0x70] sm:$0xff] }
  0x25   : > { %3161 = vmatpush3.msra.mxu0 %v619_v3  ;;  %v2990_v16 = vld [vmem:[%s4227_s4 + $0x68] sm:$0xff]  ;;  %v2989_v17 = vld [vmem:[%s4227_s4 + $0x60] sm:$0xff]  ;;  %v1308_v18 = vld [vmem:[%s4229_s21 + $0x18] sm:$0xff]  ;;  %s608_s4 = scalar_lea.vmem %s4230_s1, %s2955_s20 }
  0x26   : > { %3162 = vmatprep.subr.mxu0 %v3537_v1  ;;  %v1307_v19 = vld [vmem:[%s4229_s21 + $0x10] sm:$0xff]  ;;  %v1306_v20 = vld [vmem:[%s4229_s21 + $0x8] sm:$0xff]  ;;  %v1305_v21 = vld [vmem:[%s4229_s21] sm:$0xff] }
  0x27   : > { %3163 = vmatpush3.msra.mxu0 %v618_v4  ;;  %v3807_v22 = vld [vmem:[%s608_s4] sm:$0xff]  ;;  %v708_v44 = vld [vmem:[%s4233_s6 + $0x18] sm:$0xff]  ;;  %v707_v45 = vld [vmem:[%s4233_s6 + $0x10] sm:$0xff]  ;;  %s599_s4 = sand.u32 1, %s3519_s28  }
  0x28   : > { %3165 = vmatmul.mubr.msk.f32.vlgmr.msra.gmra.mxu0 %vm629_vm1, %v3720_v5  ;;  %3178 = vmatprep.subr.mxu0 %v3537_v1  ;;  %v2957_v23 = vld [vmem:[%s4231_s5] ss:$0 sm:$0xff]  ;;  %v2966_v27 = vld [vmem:[%s4231_s5 + $0x1] ss:$0 sm:$0xff]  ;;  %v2980_v32 = vld [vmem:[%s4231_s5 + $0x2] ss:$0 sm:$0xff] }
  0x29   : > { %3179 = vmatpush3.msra.mxu0 %v2964_v6  ;;  %3186 = vmatprep.mubr.msk.f32.mxu0 %vm3538_vm0, %v3537_v1  ;;  %v2994_v36 = vld [vmem:[%s4231_s5 + $0x3] ss:$0 sm:$0xff]  ;;  %v3004_v40 = vld [vmem:[%s4232_s3] ss:$0 sm:$0xff]  ;;  %v706_v46 = vld [vmem:[%s4233_s6 + $0x8] sm:$0xff]  ;;  %s2954_s0 = sshll.u32 %s599_s4, 3  ;;  %s2864_s5 = scalar_lea.hbm %s4207_s18, %s3055_s23 }
  0x2a   : > { %3180 = vmatprep.subr.mxu0 %v3537_v1  ;;  %3168 = vmatpush3.msra.mxu1 %v708_v44  ;;  %v705_v47 = vld [vmem:[%s4233_s6] sm:$0xff]  ;;  %v2971_v52 = vld [vmem:[%s4233_s6 + $0x38] sm:$0xff]  ;;  %v2970_v53 = vld [vmem:[%s4233_s6 + $0x30] sm:$0xff]  ;;  %s601_s29 = scalar_lea.vmem [#allocation4], %s2954_s0 }
  0x2b   : > { %3181 = vmatpush3.msra.mxu0 %v2963_v7  ;;  %3169 = vmatprep.subr.mxu1 %v3537_v1  ;;  %v2969_v54 = vld [vmem:[%s4233_s6 + $0x28] sm:$0xff]  ;;  %v2968_v55 = vld [vmem:[%s4233_s6 + $0x20] sm:$0xff]  ;;  %v2985_v56 = vld [vmem:[%s4233_s6 + $0x58] sm:$0xff]  ;;  %s2866_s22 = sshll.u32 %s601_s29, 4  ;;  %s2867_s22 = int_to_ptr.vmem [resolvable:$true] %s2866_s22 }
  0x2c   : > { %3182 = vmatprep.subr.mxu0 %v3537_v1  ;;  %3170 = vmatpush3.msra.mxu1 %v707_v45  ;;  %v2984_v57 = vld [vmem:[%s4233_s6 + $0x50] sm:$0xff]  ;;  %v2983_v58 = vld [vmem:[%s4233_s6 + $0x48] sm:$0xff]  ;;  %v2959_v59 = vld [vmem:[%s4196_s7] ss:$0 sm:$0xff]  ;;  %s3459_s24 = scalar_lea.vmem %s2867_s22, 128  ;;  %p3466_p1 = scmp.lt.s32.totalorder %s2867_s22, %s3464_s26 }
  0x2d   : > { %3183 = vmatpush3.msra.mxu0 %v2962_v8  ;;  %3171 = vmatprep.subr.mxu1 %v3537_v1  ;;  %v2982_v6 = vld [vmem:[%s4233_s6 + $0x40] sm:$0xff]  ;;  %v2999_v7 = vld [vmem:[%s4233_s6 + $0x78] sm:$0xff]  ;;  %v2998_v8 = vld [vmem:[%s4233_s6 + $0x70] sm:$0xff]  ;;  %p3460_p12 = scmp.ne.s32.totalorder %s2867_s22, %s3459_s24  ;;  %p3467_p2 = scmp.lt.s32.totalorder %s3465_s30, %s3459_s24 }
  0x2e   : > { %3184 = vmatprep.subr.mxu0 %v3537_v1  ;;  %3172 = vmatpush3.msra.mxu1 %v706_v46 }
  0x2f   : > { %3185 = vmatpush3.msra.mxu0 %v2961_v9  ;;  %3173 = vmatprep.subr.mxu1 %v3537_v1  ;;  %v2997_v9 = vld [vmem:[%s4233_s6 + $0x68] sm:$0xff]  ;;  %p3461_p13 = pnand %p3460_p12, %p3675_p4  ;;  %p3468_p3 = por %p3467_p2, %p3466_p1 }
  0x30   : > { %3187 = vmatmul.mubr.msk.f32.vlgmr.msra.gmra.mxu0 %vm629_vm1, %v3720_v5  ;;  %3200 = vmatprep.subr.mxu0 %v3537_v1 }
  0x31   : > { %3201 = vmatpush3.msra.mxu0 %v2978_v10  ;;  %3208 = vmatprep.mubr.msk.f32.mxu0 %vm3538_vm0, %v3537_v1  ;;  %v2996_v10 = vld [vmem:[%s4233_s6 + $0x60] sm:$0xff]  ;;  %s2852_s6 = scalar_lea.sflag [#allocation5], %s599_s4  ;;  %p3462_p0 = pneg %p3461_p13 }
  0x32   : > { %3202 = vmatprep.subr.mxu0 %v3537_v1  ;;  %3174 = vmatpush3.msra.mxu1 %v705_v47 }
  0x33   : > { %3203 = vmatpush3.msra.mxu0 %v2977_v11  ;;  %3176 = vmatmul.mubr.msk.f32.vlgmr.msra.gmra.mxu1 %vm629_vm1, %v3720_v5  ;;  %p3469_p5 = pnand %p3468_p3, %p3462_p0 }
  0x34   : > { %3204 = vmatprep.subr.mxu0 %v3537_v1  ;;  %3189 = vmatprep.subr.mxu1 %v3537_v1 }
  0x35   : > { %3205 = vmatpush3.msra.mxu0 %v2976_v12  ;;  %3197 = vmatprep.mubr.msk.f32.mxu1 %vm3538_vm0, %v3537_v1  ;;  %v2973_v12 = vld [vmem:[%s4196_s7 + $0x1] ss:$0 sm:$0xff] }
  0x36   : > { %3206 = vmatprep.subr.mxu0 %v3537_v1  ;;  %3190 = vmatpush3.msra.mxu1 %v2971_v52 }
  0x37   : > { %3207 = vmatpush3.msra.mxu0 %v2975_v13  ;;  %3191 = vmatprep.subr.mxu1 %v3537_v1 }
  0x38   : > { %3209 = vmatmul.mubr.msk.f32.vlgmr.msra.gmra.mxu0 %vm629_vm1, %v3720_v5  ;;  %3222 = vmatprep.subr.mxu0 %v3537_v1 }
  0x39   : > { %3223 = vmatpush3.msra.mxu0 %v2992_v14  ;;  %3230 = vmatprep.mubr.msk.f32.mxu0 %vm3538_vm0, %v3537_v1 }
  0x3a   : > { %3224 = vmatprep.subr.mxu0 %v3537_v1  ;;  %3192 = vmatpush3.msra.mxu1 %v2970_v53 }
  0x3b   : > { %3225 = vmatpush3.msra.mxu0 %v2991_v15  ;;  %3193 = vmatprep.subr.mxu1 %v3537_v1 }
  0x3c   : > { %3226 = vmatprep.subr.mxu0 %v3537_v1  ;;  %3194 = vmatpush3.msra.mxu1 %v2969_v54 }
  0x3d   : > { %3227 = vmatpush3.msra.mxu0 %v2990_v16  ;;  %3195 = vmatprep.subr.mxu1 %v3537_v1 }
  0x3e   : > { %3228 = vmatprep.subr.mxu0 %v3537_v1  ;;  %3196 = vmatpush3.msra.mxu1 %v2968_v55  ;;  %v3025_v55 = vld [vmem:[%s4229_s21 + $0x58] sm:$0xff] }
  0x3f   : > { %3229 = vmatpush3.msra.mxu0 %v2989_v17  ;;  %3198 = vmatmul.mubr.msk.f32.vlgmr.msra.gmra.mxu1 %vm629_vm1, %v3720_v5 }
  0x40   : > { %3231 = vmatmul.mubr.msk.f32.vlgmr.msra.gmra.mxu0 %vm629_vm1, %v3720_v5  ;;  %3244 = vmatprep.subr.mxu0 %v3537_v1 }
  0x41   : > { %3245 = vmatpush3.msra.mxu0 %v1308_v18  ;;  %3252 = vmatprep.mubr.msk.f32.mxu0 %vm3538_vm0, %v3537_v1 }
  0x42   : > { %3246 = vmatprep.subr.mxu0 %v3537_v1  ;;  %3211 = vmatprep.subr.mxu1 %v3537_v1 }
  0x43   : > { %3247 = vmatpush3.msra.mxu0 %v1307_v19  ;;  %3212 = vmatpush3.msra.mxu1 %v2985_v56  ;;  %v3013_v19 = vld [vmem:[%s4229_s21 + $0x38] sm:$0xff]  ;;  %v3024_v56 = vld [vmem:[%s4229_s21 + $0x50] sm:$0xff] }
  0x44   : > { %3248 = vmatprep.subr.mxu0 %v3537_v1  ;;  %3219 = vmatprep.mubr.msk.f32.mxu1 %vm3538_vm0, %v3537_v1 }
  0x45   : > { %3249 = vmatpush3.msra.mxu0 %v1306_v20  ;;  %3213 = vmatprep.subr.mxu1 %v3537_v1  ;;  %v3012_v20 = vld [vmem:[%s4229_s21 + $0x30] sm:$0xff] }
  0x46   : > { %3250 = vmatprep.subr.mxu0 %v3537_v1  ;;  %3214 = vmatpush3.msra.mxu1 %v2984_v57  ;;  %v3023_v57 = vld [vmem:[%s4229_s21 + $0x48] sm:$0xff] }
  0x47   : > { %3251 = vmatpush3.msra.mxu0 %v1305_v21  ;;  %3215 = vmatprep.subr.mxu1 %v3537_v1  ;;  %v3011_v21 = vld [vmem:[%s4229_s21 + $0x28] sm:$0xff] }
  0x48   : > { %3253 = vmatmul.mubr.msk.f32.vlgmr.msra.gmra.mxu0 %vm629_vm1, %v3807_v22  ;;  %3255 = vmatprep.subr.mxu0 %v3537_v1 }
  0x49   : > { %3257 = vmatprep.mubr.msk.f32.mxu0 %vm3538_vm0, %v3537_v1  ;;  %3216 = vmatpush3.msra.mxu1 %v2983_v58  ;;  %v3022_v58 = vld [vmem:[%s4229_s21 + $0x40] sm:$0xff] }
  0x4a   : > { %3217 = vmatprep.subr.mxu1 %v3537_v1 }
  0x4b   : > { %3218 = vmatpush3.msra.mxu1 %v2982_v6 }
  0x4c   : > { %3220 = vmatmul.mubr.msk.f32.vlgmr.msra.gmra.mxu1 %vm629_vm1, %v3720_v5  ;;  %3233 = vmatprep.subr.mxu1 %v3537_v1 }
  0x4d   : > { %3234 = vmatpush3.msra.mxu1 %v2999_v7  ;;  %3241 = vmatprep.mubr.msk.f32.mxu1 %vm3538_vm0, %v3537_v1 }
  0x4e   : > { %3235 = vmatprep.subr.mxu1 %v3537_v1 }
  0x4f   : > { %3236 = vmatpush3.msra.mxu1 %v2998_v8 }
  0x50   : > { %3237 = vmatprep.subr.mxu1 %v3537_v1 }
  0x51   : > { %3238 = vmatpush3.msra.mxu1 %v2997_v9 }
  0x52   : > { %3239 = vmatprep.subr.mxu1 %v3537_v1 }
  0x53   : > { %3240 = vmatpush3.msra.mxu1 %v2996_v10 }
  0x54   : > { %3242 = vmatmul.mubr.msk.f32.vlgmr.msra.gmra.mxu1 %vm629_vm1, %v3720_v5  ;;  %3260 = vmatprep.subr.mxu1 %v3537_v1  ;;  %v1554_v5 = vld [vmem:[%s4197_s8] sm:$0xff] }
  0x55   : > { %3262 = vmatprep.mubr.msk.f32.mxu1 %vm3538_vm0, %v3537_v1 }
  0xe8   : > { %v699_v24 = vpop.f32.mrf.mxu0 }
  0xe9   : > { %v700_v25 = vadd.f32 %v2957_v23, %v699_v24  ;;  %v3010_v23 = vld [vmem:[%s4229_s21 + $0x20] sm:$0xff] }
  0xea   : > { %v3166_v26 = vpop.f32.mrf.mxu0  ;;  %v2987_v24 = vld [vmem:[%s4196_s7 + $0x2] ss:$0 sm:$0xff] }
  0xeb   : > { %704 = vst.msk [vmem:[#allocation2] sm:$0xff] %vm703_vm2, %v700_v25 }
  0xf0   : > { %v866_v28 = vpop.f32.mrf.mxu0 }
  0xf1   : > { %v867_v29 = vadd.f32 %v2966_v27, %v866_v28  ;;  %v3001_v28 = vld [vmem:[%s4196_s7 + $0x3] ss:$0 sm:$0xff] }
  0xf2   : > { %v3188_v30 = vpop.f32.mrf.mxu0  ;;  %v1390_v31 = vld [vmem:[#allocation2] sm:$0xff] }
  0xf3   : > { %871 = vst.msk [vmem:[#allocation2 + $0x8] sm:$0xff] %vm703_vm2, %v867_v29  ;;  %3256 = vmatpush3.xpose.msk.msra.mxu0 %vm703_vm2, %v1390_v31  ;;  %v782_v60 = vpop.f32.mrf.mxu1 }
  0xf4   : > { %3265 = vmatprep.subr.mxu0 %v3537_v1  ;;  %v783_v61 = vadd.f32 %v2959_v59, %v782_v60 }
  0xf5   : > { %v3177_v62 = vpop.f32.mrf.mxu1 }
  0xf6   : > { %786 = vst.msk [vmem:[#allocation3] sm:$0xff] %vm703_vm2, %v783_v61  ;;  %v3027_v62 = vld [vmem:[%s4232_s3 + $0x2] ss:$0 sm:$0xff] }
  0xf8   : > { %v1036_v33 = vpop.f32.mrf.mxu0 }
  0xf9   : > { %v1037_v34 = vadd.f32 %v2980_v32, %v1036_v33 }
  0xfa   : > { %v3210_v35 = vpop.f32.mrf.mxu0  ;;  %v1713_v33 = vld [vmem:[#allocation2 + $0x8] sm:$0xff] }
  0xfb   : > { %1041 = vst.msk [vmem:[#allocation2 + $0x10] sm:$0xff] %vm703_vm2, %v1037_v34  ;;  %v3015_v35 = vld [vmem:[%s4232_s3 + $0x1] ss:$0 sm:$0xff] }
  0xfd   : > { %v1391_v11 = vld [vmem:[#allocation3] sm:$0xff] }
  0xfe   : > { %3261 = vmatpush3.msra.mxu1 %v1391_v11 }
  0xff   : > { %3270 = vmatprep.subr.mxu1 %v3537_v1  ;;  %v951_v13 = vpop.f32.mrf.mxu1 }
 0x100   : > { %v1206_v37 = vpop.f32.mrf.mxu0  ;;  %v952_v14 = vadd.f32 %v2973_v12, %v951_v13 }
 0x101   : > { %v1207_v38 = vadd.f32 %v2994_v36, %v1206_v37  ;;  %v3199_v15 = vpop.f32.mrf.mxu1 }
 0x102   : > { %v3232_v39 = vpop.f32.mrf.mxu0  ;;  %956 = vst.msk [vmem:[#allocation3 + $0x8] sm:$0xff] %vm703_vm2, %v952_v14  ;;  %v2037_v60 = vld [vmem:[#allocation2 + $0x10] sm:$0xff] }
 0x103   : > { %1211 = vst.msk [vmem:[#allocation2 + $0x18] sm:$0xff] %vm703_vm2, %v1207_v38 }
 0x108   : > { %v1386_v41 = vpop.f32.mrf.mxu0 }
 0x109   : > { %v1387_v42 = vadd.f32 %v3004_v40, %v1386_v41  ;;  %v1715_v39 = vld [vmem:[#allocation3 + $0x8] sm:$0xff] }
 0x10a   : > { %v3254_v43 = vpop.f32.mrf.mxu0 }
 0x10b   : > { %3258 = vmatmul.mubr.msk.f32.vlgmr.msra.gmra.mxu0 %vm703_vm2, %v1387_v42 }
 0x10c   : > { %3267 = vmatprep.mubr.msk.f32.mxu0 %vm3538_vm0, %v3537_v1  ;;  %3266 = vmatpush3.msra.mxu0 %v1554_v5  ;;  %v1121_v25 = vpop.f32.mrf.mxu1 }
 0x10d   : > { %3281 = vmatprep.subr.mxu0 %v3537_v1  ;;  %v1122_v26 = vadd.f32 %v2987_v24, %v1121_v25  ;;  %v3036_v24 = vld [vmem:[%s4229_s21 + $0x70] sm:$0xff]  ;;  %v3035_v25 = vld [vmem:[%s4229_s21 + $0x68] sm:$0xff] }
 0x10e   : > { %v3221_v27 = vpop.f32.mrf.mxu1 }
 0x10f   : > { %1126 = vst.msk [vmem:[#allocation3 + $0x10] sm:$0xff] %vm703_vm2, %v1122_v26  ;;  %v3034_v26 = vld [vmem:[%s4229_s21 + $0x60] sm:$0xff] }
 0x114   : > { %v1291_v29 = vpop.f32.mrf.mxu1 }
 0x115   : > { %v1292_v30 = vadd.f32 %v3001_v28, %v1291_v29  ;;  %v2361_v28 = vld [vmem:[#allocation2 + $0x18] sm:$0xff] }
 0x116   : > { %v3243_v31 = vpop.f32.mrf.mxu1 }
 0x117   : > { %1296 = vst.msk [vmem:[#allocation3 + $0x18] sm:$0xff] %vm703_vm2, %v1292_v30  ;;  %v3039_v30 = vld [vmem:[%s4232_s3 + $0x3] ss:$0 sm:$0xff] }
 0x1cb   : > { %v1465_v48 = vpop.f32.mrf.mxu0 }
 0x1cc   : > { %v1469_v49 = vmul.f32 0.35355338, %v1465_v48 }
 0x1cd   : > { %v3259_v50 = vpop.f32.mrf.mxu0 }
 0x1ce   : > { %v1470_v51 = vsel %vm703_vm2, %v1469_v49, -inf }
 0x1cf   : > { %1471 = vmax.xlane.f32.xlu0 %v1470_v51  ;;  %v3020_v51 = vld [vmem:[%s4197_s8 + $0x8] sm:$0xff] }
 0x258   : > { %v1472_v63 = vpop.xlane.xlu0 %1471 }
 0x259   : > { %v1473_v0 = vsub.f32 %v1469_v49, %v1472_v63 }
 0x25b   : > { %v1474_v2 = vmul.f32 1.442695, %v1473_v0 }
 0x25d   : > { %3435 = vpow2.f32 %v1474_v2 }
 0x26a   : > { %v3436_v3 = vpop.eup %3435 }
 0x26b   : > { %v1476_v4 = vsel %vm703_vm2, %v3436_v3, 0.0 }
 0x26c   : > { %1477 = vadd.xlane.f32.xlu0 %v1476_v4  ;;  %v3003_v4 = vld [vmem:[%s4198_s9] ss:$0 sm:$0xff] }
 0x2f5   : > { %v1478_v16 = vpop.xlane.xlu0 %1477 }
 0x2f6   : > { %3437 = vrcp.f32 %v1478_v16 }
 0x303   : > { %v3438_v17 = vpop.eup %3437 }
 0x304   : > { %v1480_v18 = vmul.f32 %v3438_v17, %v3436_v3  ;;  %v2039_v3 = vld [vmem:[#allocation3 + $0x10] sm:$0xff] }
 0x306   : > { %3263 = vmatmul.mubr.msk.f32.vlgmr.msra.gmra.mxu1 %vm703_vm2, %v1480_v18  ;;  %v3032_v18 = vld [vmem:[%s4197_s8 + $0x10] sm:$0xff] }
 0x307   : > { %3271 = vmatpush3.msra.mxu1 %v3013_v19  ;;  %3278 = vmatprep.mubr.msk.f32.mxu1 %vm3538_vm0, %v3537_v1 }
 0x308   : > { %3272 = vmatprep.subr.mxu1 %v3537_v1 }
 0x309   : > { %3273 = vmatpush3.msra.mxu1 %v3012_v20 }
 0x30a   : > { %3274 = vmatprep.subr.mxu1 %v3537_v1 }
 0x30b   : > { %3275 = vmatpush3.msra.mxu1 %v3011_v21 }
 0x30c   : > { %3276 = vmatprep.subr.mxu1 %v3537_v1 }
 0x30d   : > { %3277 = vmatpush3.msra.mxu1 %v3010_v23  ;;  %v3037_v23 = vld [vmem:[%s4229_s21 + $0x78] sm:$0xff] }
 0x30e   : > { %3279 = vmatmul.mubr.msk.f32.vlgmr.msra.gmra.mxu1 %vm629_vm1, %v3807_v22  ;;  %3291 = vmatprep.subr.mxu1 %v3537_v1 }
 0x30f   : > { %3293 = vmatprep.mubr.msk.f32.mxu1 %vm3538_vm0, %v3537_v1  ;;  %3292 = vmatpush3.msra.mxu1 %v3020_v51 }
 0x310   : > { %3307 = vmatprep.subr.mxu1 %v3537_v1 }
 0x3c6   : > { %v1550_v32 = vpop.f32.mrf.mxu1 }
 0x3c7   : > { %3268 = vmatmul.mubr.msk.f32.vlgmr.msra.gmra.mxu0 %vm703_vm2, %v1550_v32 }
 0x3c8   : > { %3282 = vmatpush3.xpose.msk.msra.mxu0 %vm703_vm2, %v1713_v33  ;;  %v3264_v34 = vpop.f32.mrf.mxu1  ;;  %3283 = vmatprep.mubr.msk.f32.mxu0 %vm3538_vm0, %v3537_v1 }
 0x3c9   : > { %3286 = vmatprep.subr.mxu0 %v3537_v1  ;;  %v2363_v34 = vld [vmem:[#allocation3 + $0x18] sm:$0xff] }
 0x3ce   : > { %v1708_v36 = vpop.f32.mrf.mxu1 }
 0x3cf   : > { %v1709_v37 = vadd.f32 %v3015_v35, %v1708_v36 }
 0x3d0   : > { %v3280_v38 = vpop.f32.mrf.mxu1 }
 0x3d1   : > { %3284 = vmatmul.mubr.msk.f32.vlgmr.msra.gmra.mxu0 %vm703_vm2, %v1709_v37 }
 0x3d2   : > { %3287 = vmatpush3.msra.mxu0 %v1715_v39  ;;  %3288 = vmatprep.mubr.msk.f32.mxu0 %vm3538_vm0, %v3537_v1 }
 0x3d3   : > { %3296 = vmatprep.subr.mxu0 %v3537_v1 }
 0x487   : > { %v1624_v40 = vpop.f32.mrf.mxu0 }
 0x488   : > { %v1628_v6 = vadd.f32 %v3003_v4, %v1624_v40  ;;  %v2730_v4 = vld [vmem:[%s4201_s12 + $0x30] sm:$0xff] }
 0x489   : > { %v3269_v41 = vpop.f32.mrf.mxu0 }
 0x491   : > { %v1788_v42 = vpop.f32.mrf.mxu0 }
 0x492   : > { %v1792_v43 = vmul.f32 0.35355338, %v1788_v42 }
 0x493   : > { %v3285_v44 = vpop.f32.mrf.mxu0 }
 0x494   : > { %v1793_v45 = vsel %vm703_vm2, %v1792_v43, -inf }
 0x495   : > { %1794 = vmax.xlane.f32.xlu1 %v1793_v45 }
 0x51e   : > { %v1795_v46 = vpop.xlane.xlu1 %1794 }
 0x51f   : > { %v1796_v47 = vsub.f32 %v1792_v43, %v1795_v46 }
 0x521   : > { %v1797_v48 = vmul.f32 1.442695, %v1796_v47  ;;  %v3044_v47 = vld [vmem:[%s4197_s8 + $0x18] sm:$0xff] }
 0x523   : > { %3439 = vpow2.f32 %v1797_v48 }
 0x530   : > { %v3440_v49 = vpop.eup %3439 }
 0x531   : > { %v1799_v50 = vsel %vm703_vm2, %v3440_v49, 0.0 }
 0x532   : > { %1800 = vadd.xlane.f32.xlu1 %v1799_v50 }
 0x5bb   : > { %v1801_v52 = vpop.xlane.xlu1 %1800 }
 0x5bc   : > { %3441 = vrcp.f32 %v1801_v52 }
 0x5c9   : > { %v3442_v53 = vpop.eup %3441 }
 0x5ca   : > { %v1803_v54 = vmul.f32 %v3442_v53, %v3440_v49 }
 0x5cc   : > { %3289 = vmatmul.mubr.msk.f32.vlgmr.msra.gmra.mxu0 %vm703_vm2, %v1803_v54 }
 0x5cd   : > { %3297 = vmatpush3.msra.mxu0 %v3025_v55  ;;  %3304 = vmatprep.mubr.msk.f32.mxu0 %vm3538_vm0, %v3537_v1 }
 0x5ce   : > { %3298 = vmatprep.subr.mxu0 %v3537_v1 }
 0x5cf   : > { %3299 = vmatpush3.msra.mxu0 %v3024_v56 }
 0x5d0   : > { %3300 = vmatprep.subr.mxu0 %v3537_v1 }
 0x5d1   : > { %3301 = vmatpush3.msra.mxu0 %v3023_v57 }
 0x5d2   : > { %3302 = vmatprep.subr.mxu0 %v3537_v1 }
 0x5d3   : > { %3303 = vmatpush3.msra.mxu0 %v3022_v58 }
 0x5d4   : > { %3305 = vmatmul.mubr.msk.f32.vlgmr.msra.gmra.mxu0 %vm629_vm1, %v3807_v22  ;;  %3317 = vmatprep.subr.mxu0 %v3537_v1 }
 0x5d5   : > { %3319 = vmatprep.mubr.msk.f32.mxu0 %vm3538_vm0, %v3537_v1  ;;  %3318 = vmatpush3.msra.mxu0 %v3032_v18 }
 0x5d6   : > { %3333 = vmatprep.subr.mxu0 %v3537_v1 }
 0x68c   : > { %v1873_v59 = vpop.f32.mrf.mxu0 }
 0x68d   : > { %3294 = vmatmul.mubr.msk.f32.vlgmr.msra.gmra.mxu1 %vm703_vm2, %v1873_v59 }
 0x68e   : > { %3308 = vmatpush3.xpose.msk.msra.mxu1 %vm703_vm2, %v2037_v60  ;;  %v3290_v61 = vpop.f32.mrf.mxu0  ;;  %3309 = vmatprep.mubr.msk.f32.mxu1 %vm3538_vm0, %v3537_v1 }
 0x68f   : > { %3312 = vmatprep.subr.mxu1 %v3537_v1 }
 0x694   : > { %v2032_v63 = vpop.f32.mrf.mxu0 }
 0x695   : > { %v2033_v0 = vadd.f32 %v3027_v62, %v2032_v63  ;;  %v2642_v63 = vld [vmem:[%s4199_s10 + $0x18] sm:$0xff] }
 0x696   : > { %v3306_v2 = vpop.f32.mrf.mxu0 }
 0x697   : > { %3310 = vmatmul.mubr.msk.f32.vlgmr.msra.gmra.mxu1 %vm703_vm2, %v2033_v0  ;;  %v2640_v0 = vld [vmem:[%s4199_s10 + $0x8] sm:$0xff]  ;;  %v2639_v2 = vld [vmem:[%s4199_s10] sm:$0xff] }
 0x698   : > { %3313 = vmatpush3.msra.mxu1 %v2039_v3  ;;  %3314 = vmatprep.mubr.msk.f32.mxu1 %vm3538_vm0, %v3537_v1  ;;  %v2731_v3 = vld [vmem:[%s4201_s12 + $0x38] sm:$0xff] }
 0x699   : > { %3322 = vmatprep.subr.mxu1 %v3537_v1 }
 0x74d   : > { %v1948_v7 = vpop.f32.mrf.mxu1 }
 0x74e   : > { %v1952_v8 = vadd.f32 %v1948_v7, %v1628_v6  ;;  %v2729_v6 = vld [vmem:[%s4201_s12 + $0x28] sm:$0xff]  ;;  %v2728_v7 = vld [vmem:[%s4201_s12 + $0x20] sm:$0xff] }
 0x74f   : > { %v3295_v9 = vpop.f32.mrf.mxu1 }
 0x757   : > { %v2112_v10 = vpop.f32.mrf.mxu1 }
 0x758   : > { %v2116_v11 = vmul.f32 0.35355338, %v2112_v10 }
 0x759   : > { %v3311_v12 = vpop.f32.mrf.mxu1 }
 0x75a   : > { %v2117_v13 = vsel %vm703_vm2, %v2116_v11, -inf }
 0x75b   : > { %2118 = vmax.xlane.f32.xlu0 %v2117_v13 }
 0x7e4   : > { %v2119_v14 = vpop.xlane.xlu0 %2118 }
 0x7e5   : > { %v2120_v15 = vsub.f32 %v2116_v11, %v2119_v14 }
 0x7e7   : > { %v2121_v5 = vmul.f32 1.442695, %v2120_v15 }
 0x7e9   : > { %3443 = vpow2.f32 %v2121_v5 }
 0x7f6   : > { %v3444_v16 = vpop.eup %3443 }
 0x7f7   : > { %v2123_v17 = vsel %vm703_vm2, %v3444_v16, 0.0 }
 0x7f8   : > { %2124 = vadd.xlane.f32.xlu1 %v2123_v17  ;;  %v3046_v17 = vld [vmem:[%s4203_s14] ss:$0 sm:$0xff] }
 0x881   : > { %v2125_v19 = vpop.xlane.xlu1 %2124 }
 0x882   : > { %3445 = vrcp.f32 %v2125_v19  ;;  %v3047_v19 = vld [vmem:[%s4204_s15] ss:$0 sm:$0xff] }
 0x88f   : > { %v3446_v20 = vpop.eup %3445 }
 0x890   : > { %v2127_v21 = vmul.f32 %v3446_v20, %v3444_v16 }
 0x892   : > { %3315 = vmatmul.mubr.msk.f32.vlgmr.msra.gmra.mxu1 %vm703_vm2, %v2127_v21 }
 0x893   : > { %3323 = vmatpush3.msra.mxu1 %v3037_v23  ;;  %3330 = vmatprep.mubr.msk.f32.mxu1 %vm3538_vm0, %v3537_v1  ;;  %v2726_v23 = vld [vmem:[%s4201_s12 + $0x10] sm:$0xff] }
 0x894   : > { %3324 = vmatprep.subr.mxu1 %v3537_v1 }
 0x895   : > { %3325 = vmatpush3.msra.mxu1 %v3036_v24  ;;  %v2725_v24 = vld [vmem:[%s4201_s12 + $0x8] sm:$0xff] }
 0x896   : > { %3326 = vmatprep.subr.mxu1 %v3537_v1 }
 0x897   : > { %3327 = vmatpush3.msra.mxu1 %v3035_v25  ;;  %v2724_v25 = vld [vmem:[%s4201_s12] sm:$0xff] }
 0x898   : > { %3328 = vmatprep.subr.mxu1 %v3537_v1 }
 0x899   : > { %3329 = vmatpush3.msra.mxu1 %v3034_v26  ;;  %v3048_v26 = vld [vmem:[%s4200_s11] ss:$0 sm:$0xff] }
 0x89a   : > { %3331 = vmatmul.mubr.msk.f32.vlgmr.msra.gmra.mxu1 %vm629_vm1, %v3807_v22  ;;  %3343 = vmatprep.subr.mxu1 %v3537_v1 }
 0x89b   : > { %3345 = vmatprep.mubr.msk.f32.mxu1 %vm3538_vm0, %v3537_v1  ;;  %3344 = vmatpush3.msra.mxu1 %v3044_v47 }
 0x89c   : > { %3359 = vmatprep.subr.mxu1 %v3537_v1 }
 0x952   : > { %v2197_v27 = vpop.f32.mrf.mxu1 }
 0x953   : > { %3320 = vmatmul.mubr.msk.f32.vlgmr.msra.gmra.mxu0 %vm703_vm2, %v2197_v27 }
 0x954   : > { %3334 = vmatpush3.xpose.msk.msra.mxu0 %vm703_vm2, %v2361_v28  ;;  %v3316_v29 = vpop.f32.mrf.mxu1  ;;  %3335 = vmatprep.mubr.msk.f32.mxu0 %vm3538_vm0, %v3537_v1 }
 0x955   : > { %3338 = vmatprep.subr.mxu0 %v3537_v1 }
 0x95a   : > { %v2356_v31 = vpop.f32.mrf.mxu1 }
 0x95b   : > { %v2357_v32 = vadd.f32 %v3039_v30, %v2356_v31  ;;  %v3050_v31 = vld [vmem:[%s4202_s13] ss:$0 sm:$0xff] }
 0x95c   : > { %v3332_v33 = vpop.f32.mrf.mxu1 }
 0x95d   : > { %3336 = vmatmul.mubr.msk.f32.vlgmr.msra.gmra.mxu0 %vm703_vm2, %v2357_v32 }
 0x95e   : > { %3339 = vmatpush3.msra.mxu0 %v2363_v34  ;;  %3340 = vmatprep.mubr.msk.f32.mxu0 %vm3538_vm0, %v3537_v1 }
 0x95f   : > { %3348 = vmatprep.subr.mxu0 %v3537_v1 }
 0xa13   : > { %v2272_v35 = vpop.f32.mrf.mxu0 }
 0xa14   : > { %v2276_v36 = vadd.f32 %v2272_v35, %v1952_v8  ;;  %v2727_v8 = vld [vmem:[%s4201_s12 + $0x18] sm:$0xff] }
 0xa15   : > { %v3321_v37 = vpop.f32.mrf.mxu0 }
 0xa1d   : > { %v2436_v38 = vpop.f32.mrf.mxu0 }
 0xa1e   : > { %v2440_v39 = vmul.f32 0.35355338, %v2436_v38 }
 0xa1f   : > { %v3337_v40 = vpop.f32.mrf.mxu0 }
 0xa20   : > { %v2441_v41 = vsel %vm703_vm2, %v2440_v39, -inf }
 0xa21   : > { %2442 = vmax.xlane.f32.xlu0 %v2441_v41 }
 0xaaa   : > { %v2443_v42 = vpop.xlane.xlu0 %2442 }
 0xaab   : > { %v2444_v43 = vsub.f32 %v2440_v39, %v2443_v42 }
 0xaad   : > { %v2445_v44 = vmul.f32 1.442695, %v2444_v43 }
 0xaaf   : > { %3447 = vpow2.f32 %v2445_v44 }
 0xabc   : > { %v3448_v45 = vpop.eup %3447 }
 0xabd   : > { %v2447_v46 = vsel %vm703_vm2, %v3448_v45, 0.0 }
 0xabe   : > { %2448 = vadd.xlane.f32.xlu1 %v2447_v46 }
 0xb47   : > { %v2449_v48 = vpop.xlane.xlu1 %2448 }
 0xb48   : > { %3449 = vrcp.f32 %v2449_v48 }
 0xb55   : > { %v3450_v49 = vpop.eup %3449 }
 0xb56   : > { %v2451_v50 = vmul.f32 %v3450_v49, %v3448_v45 }
 0xb58   : > { %3341 = vmatmul.mubr.msk.f32.vlgmr.msra.gmra.mxu0 %vm703_vm2, %v2451_v50  ;;  %v3052_v50 = vld [vmem:[%s4205_s16] ss:$0 sm:$0xff] }
 0xb59   : > { %3356 = vmatprep.mubr.msk.f32.mxu0 %vm3538_vm0, %v3537_v1  ;;  %3349 = vmatpush3.msra.mxu0 %v2642_v63 }
 0xb5a   : > { %3350 = vmatprep.subr.mxu0 %v3537_v1 }
 0xc18   : > { %v2521_v51 = vpop.f32.mrf.mxu0 }
 0xc19   : > { %3346 = vmatmul.mubr.msk.f32.vlgmr.msra.gmra.mxu1 %vm703_vm2, %v2521_v51 }
 0xc1a   : > { %v3342_v52 = vpop.f32.mrf.mxu0  ;;  %3375 = vmatprep.mubr.msk.f32.mxu1 %vm3538_vm0, %v3537_v1  ;;  %3360 = vmatpush3.msra.mxu1 %v2731_v3 }
 0xc1b   : > { %3361 = vmatprep.subr.mxu1 %v3537_v1  ;;  %v3053_v52 = vld [vmem:[%s4206_s17] ss:$0 sm:$0xff] }
 0xc1c   : > { %3362 = vmatpush3.msra.mxu1 %v2730_v4 }
 0xc1d   : > { %3363 = vmatprep.subr.mxu1 %v3537_v1 }
 0xc1e   : > { %3364 = vmatpush3.msra.mxu1 %v2729_v6 }
 0xc1f   : > { %3365 = vmatprep.subr.mxu1 %v3537_v1 }
 0xc20   : > { %3366 = vmatpush3.msra.mxu1 %v2728_v7 }
 0xc21   : > { %3367 = vmatprep.subr.mxu1 %v3537_v1 }
 0xc22   : > { %3368 = vmatpush3.msra.mxu1 %v2727_v8 }
 0xc23   : > { %3369 = vmatprep.subr.mxu1 %v3537_v1 }
 0xc24   : > { %3370 = vmatpush3.msra.mxu1 %v2726_v23 }
 0xc25   : > { %3371 = vmatprep.subr.mxu1 %v3537_v1 }
 0xc26   : > { %3372 = vmatpush3.msra.mxu1 %v2725_v24 }
 0xc27   : > { %3373 = vmatprep.subr.mxu1 %v3537_v1 }
 0xc28   : > { %3374 = vmatpush3.msra.mxu1 %v2724_v25 }
 0xcd9   : > { %v2596_v53 = vpop.f32.mrf.mxu1 }
 0xcda   : > { %v2600_v54 = vadd.f32 %v2596_v53, %v2276_v36 }
 0xcdb   : > { %v3347_v55 = vpop.f32.mrf.mxu1 }
 0xcdc   : > { %v4075_v56 = vadd.f32 %v2600_v54, %v3807_v22  ;;  %v2641_v22 = vld [vmem:[%s4199_s10 + $0x10] sm:$0xff] }
 0xcdd   : > { %3351 = vmatpush3.msra.mxu0 %v2641_v22 }
 0xcde   : > { %v2604_v57 = vsel %vm629_vm1, %v4075_v56, 0.0  ;;  %3352 = vmatprep.subr.mxu0 %v3537_v1 }
 0xcdf   : > { %2605 = vadd.xlane.f32.xlu0 %v2604_v57  ;;  %3353 = vmatpush3.msra.mxu0 %v2640_v0 }
 0xce0   : > { %3354 = vmatprep.subr.mxu0 %v3537_v1 }
 0xce1   : > { %3355 = vmatpush3.msra.mxu0 %v2639_v2 }
 0xd68   : > { %v2606_v58 = vpop.xlane.xlu0 %2605 }
 0xd69   : > { %v2608_v59 = vmul.f32 0.03125, %v2606_v58 }
 0xd6b   : > { %v2609_v60 = vsub.f32 %v4075_v56, %v2608_v59 }
 0xd6d   : > { %v2610_v61 = vmul.f32 %v2609_v60, %v2609_v60 }
 0xd6f   : > { %v2611_v62 = vsel %vm629_vm1, %v2610_v61, 0.0 }
 0xd70   : > { %2612 = vadd.xlane.f32.xlu1 %v2611_v62 }
 0xdf9   : > { %v2613_v9 = vpop.xlane.xlu1 %2612 }
 0xdfa   : > { %v2614_v10 = vmul.f32 0.03125, %v2613_v9 }
 0xdfc   : > { %v2615_v11 = vadd.f32 1e-12, %v2614_v10 }
 0xdfe   : > { %3451 = vrsqrt.f32 %v2615_v11  ;;  %vm2618_vm3 = vcmp.eq.f32.partialorder %v2615_v11, inf  ;;  %v2621_v14 = vand.u32 2147483648, %v2615_v11  ;;  %vm2620_vm4 = vcmp.eq.f32.partialorder %v2615_v11, 0.0 }
 0xe0b   : > { %v3452_v12 = vpop.eup %3451 }
 0xe0c   : > { %v2617_v13 = vmul.f32 %v3452_v12, %v2615_v11 }
 0xe0e   : > { %v2619_v15 = vsel %vm2618_vm3, %v2615_v11, %v2617_v13 }
 0xe0f   : > { %v2622_v5 = vsel %vm2620_vm4, %v2621_v14, %v2619_v15 }
 0xe10   : > { %3453 = vrcp.f32 %v2622_v5 }
 0xe1d   : > { %v3454_v16 = vpop.eup %3453 }
 0xe1e   : > { %v2624_v18 = vmul.f32 %v3454_v16, %v2609_v60 }
 0xe20   : > { %v2631_v20 = vmul.f32 %v3046_v17, %v2624_v18 }
 0xe22   : > { %v2638_v21 = vadd.f32 %v3047_v19, %v2631_v20 }
 0xe24   : > { %3357 = vmatmul.mubr.msk.f32.vlgmr.msra.gmra.mxu0 %vm629_vm1, %v2638_v21 }
 0xee4   : > { %v2719_v27 = vpop.f32.mrf.mxu0 }
 0xee5   : > { %v2720_v28 = vadd.f32 %v3048_v26, %v2719_v27 }
 0xee6   : > { %v3358_v29 = vpop.f32.mrf.mxu0 }
 0xee7   : > { %v2723_v30 = vmax.f32 %v2720_v28, 0.0 }
 0xee9   : > { %3376 = vmatmul.mubr.msk.f32.vlgmr.msra.gmra.mxu1 %vm2739_vm5, %v2723_v30 }
 0xfa9   : > { %v2809_v32 = vpop.f32.mrf.mxu1 }
 0xfaa   : > { %v2810_v33 = vadd.f32 %v3050_v31, %v2809_v32 }
 0xfab   : > { %v3377_v34 = vpop.f32.mrf.mxu1 }
 0xfac   : > { %v2813_v1 = vadd.f32 %v2810_v33, %v4075_v56 }
 0xfae   : > { %v2816_v35 = vsel %vm629_vm1, %v2813_v1, 0.0 }
 0xfaf   : > { %2817 = vadd.xlane.f32.xlu0 %v2816_v35 }
0x1038   : > { %v2818_v36 = vpop.xlane.xlu0 %2817 }
0x1039   : > { %v2819_v37 = vmul.f32 0.03125, %v2818_v36 }
0x103b   : > { %v2820_v38 = vsub.f32 %v2813_v1, %v2819_v37 }
0x103d   : > { %v2821_v39 = vmul.f32 %v2820_v38, %v2820_v38 }
0x103f   : > { %v2822_v40 = vsel %vm629_vm1, %v2821_v39, 0.0 }
0x1040   : > { %2823 = vadd.xlane.f32.xlu1 %v2822_v40 }
0x10c9   : > { %v2824_v41 = vpop.xlane.xlu1 %2823 }
0x10ca   : > { %v2825_v42 = vmul.f32 0.03125, %v2824_v41 }
0x10cc   : > { %v2826_v43 = vadd.f32 1e-12, %v2825_v42 }
0x10ce   : > { %3455 = vrsqrt.f32 %v2826_v43  ;;  %vm2829_vm6 = vcmp.eq.f32.partialorder %v2826_v43, inf  ;;  %v2832_v46 = vand.u32 2147483648, %v2826_v43  ;;  %vm2831_vm7 = vcmp.eq.f32.partialorder %v2826_v43, 0.0 }
0x10db   : > { %v3456_v44 = vpop.eup %3455 }
0x10dc   : > { %v2828_v45 = vmul.f32 %v3456_v44, %v2826_v43 }
0x10de   : > { %v2830_v47 = vsel %vm2829_vm6, %v2826_v43, %v2828_v45 }
0x10df   : > { %v2833_v48 = vsel %vm2831_vm7, %v2832_v46, %v2830_v47 }
0x10e0   : > { %3457 = vrcp.f32 %v2833_v48 }
0x10ed   : > { %v3458_v49 = vpop.eup %3457 }
0x10ee   : > { %v2835_v51 = vmul.f32 %v3458_v49, %v2820_v38 }
0x10f0   : > { %v2842_v53 = vmul.f32 %v3052_v50, %v2835_v51 }
0x10f2   : > { %v2849_v54 = vadd.f32 %v3053_v52, %v2842_v53 }
0x10f4   : > { %2850 = vst.msk [vmem:[%s601_s29] sm:$0xff] %vm629_vm1, %v2849_v54 }
0x10f5   : > { %3472 = shalt.err (!%p3469_p5)
}
0x10f6   : > { %s3473_s3 = scalar_lea.hbm %s2864_s5, 128  ;;  %s3477_s1 = scalar_lea.hbm %s4207_s18, 256 }
0x10f7   : > { %p3474_p6 = scmp.ne.s32.totalorder %s2864_s5, %s3473_s3  ;;  %p3478_p10 = scmp.lt.s32.totalorder %s2864_s5, %s4207_s18 }
0x10f8   : > { %p3479_p11 = scmp.lt.s32.totalorder %s3477_s1, %s3473_s3 }
0x10f9   : > { %p3475_p7 = pnand %p3474_p6, %p3675_p4 }
0x10fa   : > { %p3480_p12 = por %p3479_p11, %p3478_p10 }
0x10fb   : > { %p3476_p9 = pneg %p3475_p7 }
0x10fd   : > { %p3481_p13 = pnand %p3480_p12, %p3476_p9 }
0x10ff   : > { %3484 = shalt.err (!%p3481_p13)
}
0x1100   : > { %3378 = dma.vmem_to_hbm [thread:$0]  (%p3675_p4), %s2867_s22, 128, %s2864_s5, %s2852_s6  }
0x1101 PF: > { %p3384_p0 = scmp.ge.s32.totalorder %s3535_s19, 2  ;;  %s2878_s24 = sand.u32 1, %s3515_s27  }
0x1102   : > { %s2879_s25 = scalar_lea.sflag [#allocation5], %s2878_s24 }
0x1103   : > { %p3381_p1 = pnand %p3384_p0, %p3682_p8 }
0x1105   : > { %p3382_p2 = pneg %p3381_p1 }
0x1107   : > { %3510 = dma.done.wait (%p3382_p2), %s2879_s25, 128  }
0x1108   : > { %3512 = vsyncadd (%p3382_p2), %s2879_s25, 4294967168  ;;  %s31_s19 = sadd.s32 1, %s3535_s19   ;;  %s4235_s26 = sld [smem:[#allocation7_spill]] }
0x1109   : > { %p28_p3 = scmp.ge.s32.totalorder %s31_s19, 4   ;;  %s4236_s29 = sld [smem:[#allocation11_spill]] }
0x110a   : > { %s4237_s30 = sld [smem:[#allocation8_spill]]  ;;  %s4239_s27 = smov %s3519_s28 }
0x110b   : > { %s4238_s0 = sld [smem:[#allocation9_spill]]  ;;  %30 = sbr.rel (!%p28_p3) target bundleno = 12 (0xc), region = 167 }
0x110e   : > { %s4240_s28 = smov %s4235_s26 }
0x1110   :  { %2884 = vsyncpa [#allocation5], 1 }
0x1111   :  { %2886 = vsyncpa [#allocation5 + $0x1], 1 }

</bundles_post_ra>
